<compile_context>
chip_gen: v6e
topology: v6e:2x2x1
jax: 0.10.0
libtpu: 0.0.40
codegen_flags: <defaults>
</compile_context>

<pallas_src>
import functools
from typing import NamedTuple

import jax
import jax.numpy as jnp
from jax.experimental import pallas as pl
from jax.experimental.pallas import tpu as pltpu


def _round_up(x: int, m: int) -> int:
    return ((x + m - 1) // m) * m


def _vmem_budget_bytes() -> int:
    """~75% of per-core VMEM (~48 MiB on v7x, ~96 MiB on v5e/v6e)."""
    try:
        cap = pltpu.get_tpu_info().vmem_capacity_bytes
    except Exception:  # unknown chip / query unsupported -> v7x-safe default
        cap = 64 << 20
    return int(min(int(cap * 0.75), 100 << 20))


# ---------------------------------------------------------------------------
# Kernels
# ---------------------------------------------------------------------------

def _mlp_fused_kernel(x_ref, w1_ref, b1_ref, w2_ref, b2_ref, o_ref):
    # x: (tb, K)   w1: (K, H)   b1: (1, H)   w2: (H, nc_p)   b2: (1, nc_p)
    x = x_ref[...].astype(w1_ref.dtype)
    h = jnp.dot(x, w1_ref[...], preferred_element_type=jnp.float32) + b1_ref[...]
    h = jnp.maximum(h, 0.0)                                       # ReLU (f32)
    out = jnp.dot(h.astype(w2_ref.dtype), w2_ref[...],
                  preferred_element_type=jnp.float32) + b2_ref[...]
    o_ref[...] = out.astype(o_ref.dtype)


def _mlp_ksplit_kernel(x_ref, w1_ref, b1_ref, w2_ref, b2_ref, o_ref, acc_ref,
                       *, n_inputs: int, tk: int):
    # Grid = (batch_tiles, k_tiles); k is the innermost ("arbitrary") axis.
    k = pl.program_id(1)

    @pl.when(k == 0)
    def _init():
        acc_ref[...] = jnp.zeros_like(acc_ref)

    x = x_ref[...]
    if n_inputs % tk != 0:
        # Last K block runs past x's real columns; zero them so the trailing
        # (zero-padded) W1 rows can't be polluted by undefined data.
        valid = n_inputs - k * tk
        col = jax.lax.broadcasted_iota(jnp.int32, x.shape, 1)
        x = jnp.where(col < valid, x, jnp.zeros_like(x))

    acc_ref[...] += jnp.dot(x.astype(w1_ref.dtype), w1_ref[...],
                            preferred_element_type=jnp.float32)

    @pl.when(k == pl.num_programs(1) - 1)
    def _finalize():
        h = jnp.maximum(acc_ref[...] + b1_ref[...], 0.0)          # ReLU (f32)
        out = jnp.dot(h.astype(w2_ref.dtype), w2_ref[...],
                      preferred_element_type=jnp.float32) + b2_ref[...]
        o_ref[...] = out.astype(o_ref.dtype)


# ---------------------------------------------------------------------------
# Parameters & wrapper
# ---------------------------------------------------------------------------

class MLPParams(NamedTuple):
    w1: jax.Array       # (K_pad, n_hidden)   (K_pad == n_inputs in fused mode)
    b1: jax.Array       # (1, n_hidden)       f32
    w2: jax.Array       # (n_hidden, nc_p)    classes zero-padded to lane width
    b2: jax.Array       # (1, nc_p)           f32
    n_inputs: int
    n_classes: int
    mode: str           # "fused" | "ksplit"
    tk: int             # K tile size (== n_inputs in fused mode)


def prepare_params(w1, b1, w2, b2, *, weights_dtype=None, force_ksplit=False,
                   tk=None, vmem_budget=None) -> MLPParams:
    """One-time parameter preparation (padding / reshapes / optional bf16 cast),
    hoisted out of the forward so per-call HLO is just pallas_call + slice."""
    n_inputs, n_hidden = w1.shape
    n_classes = w2.shape[1]
    wdt = jnp.dtype(weights_dtype) if weights_dtype is not None else w1.dtype

    nc_p = max(128, _round_up(n_classes, 128))            # lane-dense output
    w2_p = jnp.zeros((n_hidden, nc_p), wdt).at[:, :n_classes].set(w2.astype(wdt))
    b2_p = jnp.zeros((1, nc_p), jnp.float32).at[:, :n_classes].set(
        b2.reshape(1, -1).astype(jnp.float32))
    b1_2d = b1.reshape(1, n_hidden).astype(jnp.float32)
    w1 = w1.astype(wdt)

    budget = int(vmem_budget) if vmem_budget else _vmem_budget_bytes()
    w_itm = jnp.dtype(wdt).itemsize
    resident = (n_inputs * n_hidden + n_hidden * nc_p) * w_itm + (n_hidden + nc_p) * 4
    # Fused path needs W1 resident plus at least an 8-row double-buffered x/out
    # tile; otherwise accumulate over a K grid axis instead (required on v7x
    # for large flattened inputs).
    min_fused = resident + 2 * 8 * (n_inputs + nc_p) * 4 + (4 << 20)
    use_ksplit = force_ksplit or (min_fused > budget)

    if not use_ksplit:
        return MLPParams(w1, b1_2d, w2_p, b2_p, n_inputs, n_classes, "fused", n_inputs)

    if tk is None:
        tk = min(2048, _round_up(n_inputs, 128))
    tk = max(128, _round_up(int(tk), 128))
    k_pad = _round_up(n_inputs, tk)
    if k_pad != n_inputs:                                  # zero-pad K (one-time)
        w1 = jnp.zeros((k_pad, n_hidden), wdt).at[:n_inputs, :].set(w1)
    return MLPParams(w1, b1_2d, w2_p, b2_p, n_inputs, n_classes, "ksplit", tk)


def _const_spec(block_shape, index_map, *, single):
    """BlockSpec for a grid-invariant operand (constant index_map)."""
    if single:
        # Single buffer: constant blocks gain nothing from double-buffering.
        return pl.BlockSpec(block_shape, index_map, pipeline_mode=pl.Buffered(1))
    return pl.BlockSpec(block_shape, index_map)


def neural_network_forward(x, params: MLPParams, *, tile_b=1024, vmem_budget=None):
    """Fused MLP forward.  x: (N, ...) -> flattened to (N, n_inputs) like nn.Flatten."""
    n = x.shape[0]
    x2d = x.reshape(n, -1)
    if x2d.shape[1] != params.n_inputs:
        raise ValueError(f"flattened input dim {x2d.shape[1]} != {params.n_inputs}")

    n_inputs = params.n_inputs
    n_hidden = params.w1.shape[1]
    nc_p = params.w2.shape[1]
    w_itm = params.w1.dtype.itemsize
    budget = int(vmem_budget) if vmem_budget else _vmem_budget_bytes()
    headroom = 4 << 20

    # On v7x the "parallel" batch axis is sharded across 2 TensorCores;
    # keep at least 2 batch tiles when the batch is non-trivial.
    tile_cap = tile_b if n <= 8 else min(tile_b, _round_up(pl.cdiv(n, 2), 8))

    cost = pl.CostEstimate(
        flops=2 * n * (n_inputs * n_hidden + n_hidden * nc_p),
        transcendentals=0,
        bytes_accessed=(x2d.size * x2d.dtype.itemsize
                        + (params.w1.size + params.w2.size) * w_itm
                        + (params.b1.size + params.b2.size) * 4
                        + n * nc_p * x.dtype.itemsize),
    )

    if params.mode == "fused":
        resident = (params.w1.size + params.w2.size) * w_itm + (n_hidden + nc_p) * 4
        per_row = 2 * (n_inputs + nc_p) * 4        # double-buffered x + out (f32)
        tb = max(8, ((budget - headroom - resident) // per_row) // 8 * 8)
        tb = min(tb, tile_cap, _round_up(n, 8))
        if n < 8:
            tb = n                                  # exact single block (== full dim)
        grid = (pl.cdiv(n, tb),)

        def build(single_buffer_weights):
            wspec = functools.partial(_const_spec, single=single_buffer_weights)
            in_specs = [
                pl.BlockSpec((tb, n_inputs), lambda i: (i, 0)),        # streamed x
                wspec((n_inputs, n_hidden), lambda i: (0, 0)),         # resident W1
                wspec((1, n_hidden), lambda i: (0, 0)),                # resident b1
                wspec((n_hidden, nc_p), lambda i: (0, 0)),             # resident W2
                wspec((1, nc_p), lambda i: (0, 0)),                    # resident b2
            ]
            return pl.pallas_call(
                _mlp_fused_kernel,
                out_shape=jax.ShapeDtypeStruct((n, nc_p), x.dtype),
                grid=grid,
                in_specs=in_specs,
                out_specs=pl.BlockSpec((tb, nc_p), lambda i: (i, 0)),
                compiler_params=pltpu.CompilerParams(
                    dimension_semantics=("parallel",),
                    vmem_limit_bytes=budget),
                cost_estimate=cost,
            )(x2d, params.w1, params.b1, params.w2, params.b2)

    else:  # "ksplit": W1 too large to be VMEM-resident (or forced)
        tk = params.tk
        k_pad = params.w1.shape[0]
        resident = (2 * tk * n_hidden + n_hidden * nc_p) * w_itm + (n_hidden + nc_p) * 4
        per_row = (2 * tk + 2 * nc_p + n_hidden) * 4   # x dbl + out dbl + acc
        tb = max(8, ((budget - headroom - resident) // per_row) // 8 * 8)
        tb = min(tb, tile_cap, _round_up(n, 8))
        grid = (pl.cdiv(n, tb), k_pad // tk)
        kernel = functools.partial(_mlp_ksplit_kernel, n_inputs=n_inputs, tk=tk)

        def build(single_buffer_weights):
            wspec = functools.partial(_const_spec, single=single_buffer_weights)
            in_specs = [
                pl.BlockSpec((tb, tk), lambda i, k: (i, k)),           # streamed x
                pl.BlockSpec((tk, n_hidden), lambda i, k: (k, 0)),     # streamed W1
                wspec((1, n_hidden), lambda i, k: (0, 0)),             # resident b1
                wspec((n_hidden, nc_p), lambda i, k: (0, 0)),          # resident W2
                wspec((1, nc_p), lambda i, k: (0, 0)),                 # resident b2
            ]
            return pl.pallas_call(
                kernel,
                out_shape=jax.ShapeDtypeStruct((n, nc_p), x.dtype),
                grid=grid,
                in_specs=in_specs,
                out_specs=pl.BlockSpec((tb, nc_p), lambda i, k: (i, 0)),
                scratch_shapes=[pltpu.VMEM((tb, n_hidden), jnp.float32)],
                compiler_params=pltpu.CompilerParams(
                    dimension_semantics=("parallel", "arbitrary"),
                    vmem_limit_bytes=budget),
                cost_estimate=cost,
            )(x2d, params.w1, params.b1, params.w2, params.b2)

    try:
        out = build(True)
    except Exception:
        # pipeline_mode=pl.Buffered(1) unsupported on this JAX build; fall back
        # to default double-buffered weight specs (correct, a bit more VMEM).
        out = build(False)

    # Drop the zero-padded class columns (batch is exact: no padded rows exist).
    return out[:, :params.n_classes]


def init_params(key, n_inputs, n_classes, n_hidden=128, dtype=jnp.float32):
    """Deterministic init mirroring nn.Linear's uniform(-1/sqrt(fan_in), 1/sqrt(fan_in))."""
    k1, k2, k3, k4 = jax.random.split(key, 4)
    lim1 = 1.0 / jnp.sqrt(jnp.float32(n_inputs))
    lim2 = 1.0 / jnp.sqrt(jnp.float32(n_hidden))
    # Stored transposed relative to torch's (out, in) so the kernel does x @ W.
    w1 = jax.random.uniform(k1, (n_inputs, n_hidden), dtype, -lim1, lim1)
    b1 = jax.random.uniform(k2, (n_hidden,), dtype, -lim1, lim1)
    w2 = jax.random.uniform(k3, (n_hidden, n_classes), dtype, -lim2, lim2)
    b2 = jax.random.uniform(k4, (n_classes,), dtype, -lim2, lim2)
    return w1, b1, w2, b2


if __name__ == "__main__":
    key = jax.random.PRNGKey(0)
    kx, kp, kx2, kp2 = jax.random.split(key, 4)

    # ---- required small example: N=2, C=4, H=W=16 -> n_inputs = 1024 ----------
    N, C, H, W = 2, 4, 16, 16
    n_inputs, n_hidden, n_classes = C * H * W, 128, 10
    x = jax.random.normal(kx, (N, C, H, W), jnp.float32)
    w1, b1, w2, b2 = init_params(kp, n_inputs, n_classes, n_hidden)

    params = prepare_params(w1, b1, w2, b2)              # one-time prep
    out = jax.block_until_ready(neural_network_forward(x, params))

    ref = jnp.maximum(x.reshape(N, -1) @ w1 + b1, 0.0) @ w2 + b2
    assert out.shape == (N, n_classes)
    assert jnp.allclose(out, ref, atol=1e-4, rtol=1e-4), \
        float(jnp.max(jnp.abs(out - ref)))

    # ---- exercise K-split + partial batch tile + partial K tile (small) -------
    N2, C2, H2, W2 = 10, 3, 18, 18                       # n_inputs = 972 (not /128)
    n_in2, n_cls2 = C2 * H2 * W2, 7
    x2 = jax.random.normal(kx2, (N2, C2, H2, W2), jnp.float32)
    w1b, b1b, w2b, b2b = init_params(kp2, n_in2, n_cls2, n_hidden)
    params2 = prepare_params(w1b, b1b, w2b, b2b, force_ksplit=True, tk=256)
    out2 = jax.block_until_ready(
        neural_network_forward(x2, params2, tile_b=8))   # 2 batch tiles, 4 K tiles
    ref2 = jnp.maximum(x2.reshape(N2, -1) @ w1b + b1b, 0.0) @ w2b + b2b
    assert out2.shape == (N2, n_cls2)
    assert jnp.allclose(out2, ref2, atol=1e-3, rtol=1e-3), \
        float(jnp.max(jnp.abs(out2 - ref2)))

    print("KERNEL_OK")
</pallas_src>

<mosaic_0001>
module attributes {stable_mosaic.version = 11 : i64} {
  func.func @_mlp_fused_kernel(%arg0: i32, %arg1: memref<2x1024xf32, #tpu.memory_space<vmem>>, %arg2: memref<1024x128xf32, #tpu.memory_space<vmem>>, %arg3: memref<1x128xf32, #tpu.memory_space<vmem>>, %arg4: memref<128x128xf32, #tpu.memory_space<vmem>>, %arg5: memref<1x128xf32, #tpu.memory_space<vmem>>, %arg6: memref<2x128xf32, #tpu.memory_space<vmem>>) attributes {dimension_semantics = [#tpu.dimension_semantics<parallel>], iteration_bounds = array<i64: 1>, scalar_prefetch = 0 : i64, scratch_operands = 0 : i64, tpu.core_type = #tpu.core_type<tc>, window_params = [{transform_indices = @transform_0, window_bounds = array<i64: 2, 1024>}, {pipeline_mode = #tpu.pipeline_mode<synchronous>, transform_indices = @transform_1, window_bounds = array<i64: 1024, 128>}, {pipeline_mode = #tpu.pipeline_mode<synchronous>, transform_indices = @transform_2, window_bounds = array<i64: 1, 128>}, {pipeline_mode = #tpu.pipeline_mode<synchronous>, transform_indices = @transform_3, window_bounds = array<i64: 128, 128>}, {pipeline_mode = #tpu.pipeline_mode<synchronous>, transform_indices = @transform_4, window_bounds = array<i64: 1, 128>}, {transform_indices = @transform_5, window_bounds = array<i64: 2, 128>}]} {
    %c0 = arith.constant 0 : index
    %c0_0 = arith.constant 0 : index
    %0 = vector.load %arg1[%c0, %c0_0] : memref<2x1024xf32, #tpu.memory_space<vmem>>, vector<2x1024xf32>
    %c0_1 = arith.constant 0 : index
    %c0_2 = arith.constant 0 : index
    %1 = vector.load %arg2[%c0_1, %c0_2] : memref<1024x128xf32, #tpu.memory_space<vmem>>, vector<1024x128xf32>
    %cst = arith.constant dense<0.000000e+00> : vector<2x128xf32>
    %2 = tpu.matmul %0, %1, %cst {dimension_numbers = #tpu.dot_dimension_numbers<[1], [0], [0], [1], [0, 0, 1, 1], [], []>} : vector<2x1024xf32>, vector<1024x128xf32>, vector<2x128xf32> -> vector<2x128xf32>
    %c0_3 = arith.constant 0 : index
    %c0_4 = arith.constant 0 : index
    %3 = vector.load %arg3[%c0_3, %c0_4] : memref<1x128xf32, #tpu.memory_space<vmem>>, vector<1x128xf32>
    %4 = vector.broadcast %3 : vector<1x128xf32> to vector<2x128xf32>
    %5 = arith.addf %2, %4 : vector<2x128xf32>
    %cst_5 = arith.constant 0.000000e+00 : f32
    %6 = vector.broadcast %cst_5 : f32 to vector<2x128xf32>
    %7 = arith.maximumf %5, %6 : vector<2x128xf32>
    %c0_6 = arith.constant 0 : index
    %c0_7 = arith.constant 0 : index
    %8 = vector.load %arg4[%c0_6, %c0_7] : memref<128x128xf32, #tpu.memory_space<vmem>>, vector<128x128xf32>
    %cst_8 = arith.constant dense<0.000000e+00> : vector<2x128xf32>
    %9 = tpu.matmul %7, %8, %cst_8 {dimension_numbers = #tpu.dot_dimension_numbers<[1], [0], [0], [1], [0, 0, 1, 1], [], []>} : vector<2x128xf32>, vector<128x128xf32>, vector<2x128xf32> -> vector<2x128xf32>
    %c0_9 = arith.constant 0 : index
    %c0_10 = arith.constant 0 : index
    %10 = vector.load %arg5[%c0_9, %c0_10] : memref<1x128xf32, #tpu.memory_space<vmem>>, vector<1x128xf32>
    %11 = vector.broadcast %10 : vector<1x128xf32> to vector<2x128xf32>
    %12 = arith.addf %9, %11 : vector<2x128xf32>
    %c0_11 = arith.constant 0 : index
    %c0_12 = arith.constant 0 : index
    %13 = vector.load %arg6[%c0_11, %c0_12] : memref<2x128xf32, #tpu.memory_space<vmem>>, vector<2x128xf32>
    tpu.vector_store %arg6[%c0_11, %c0_12], %12 {strides = array<i32>} : memref<2x128xf32, #tpu.memory_space<vmem>>, vector<2x128xf32>,
    return
  }
  func.func @transform_0(%arg0: i32) -> (i32, i32) {
    %c0_i32 = arith.constant 0 : i32
    %c0_i32_0 = arith.constant 0 : i32
    return %arg0, %c0_i32 : i32, i32
  }
  func.func @transform_1(%arg0: i32) -> (i32, i32) {
    %c0_i32 = arith.constant 0 : i32
    %c0_i32_0 = arith.constant 0 : i32
    %c0_i32_1 = arith.constant 0 : i32
    return %c0_i32, %c0_i32_0 : i32, i32
  }
  func.func @transform_2(%arg0: i32) -> (i32, i32) {
    %c0_i32 = arith.constant 0 : i32
    %c0_i32_0 = arith.constant 0 : i32
    %c0_i32_1 = arith.constant 0 : i32
    return %c0_i32, %c0_i32_0 : i32, i32
  }
  func.func @transform_3(%arg0: i32) -> (i32, i32) {
    %c0_i32 = arith.constant 0 : i32
    %c0_i32_0 = arith.constant 0 : i32
    %c0_i32_1 = arith.constant 0 : i32
    return %c0_i32, %c0_i32_0 : i32, i32
  }
  func.func @transform_4(%arg0: i32) -> (i32, i32) {
    %c0_i32 = arith.constant 0 : i32
    %c0_i32_0 = arith.constant 0 : i32
    %c0_i32_1 = arith.constant 0 : i32
    return %c0_i32, %c0_i32_0 : i32, i32
  }
  func.func @transform_5(%arg0: i32) -> (i32, i32) {
    %c0_i32 = arith.constant 0 : i32
    %c0_i32_0 = arith.constant 0 : i32
    return %arg0, %c0_i32 : i32, i32
  }
}

module attributes {stable_mosaic.version = 11 : i64} {
  func.func @_mlp_fused_kernel(%arg0: i32, %arg1: memref<2x1024xf32, #tpu.memory_space<vmem>>, %arg2: memref<1024x128xf32, #tpu.memory_space<vmem>>, %arg3: memref<1x128xf32, #tpu.memory_space<vmem>>, %arg4: memref<128x128xf32, #tpu.memory_space<vmem>>, %arg5: memref<1x128xf32, #tpu.memory_space<vmem>>, %arg6: memref<2x128xf32, #tpu.memory_space<vmem>>) attributes {dimension_semantics = [#tpu.dimension_semantics<parallel>], iteration_bounds = array<i64: 1>, scalar_prefetch = 0 : i64, scratch_operands = 0 : i64, tpu.core_type = #tpu.core_type<tc>, window_params = [{transform_indices = @transform_0, window_bounds = array<i64: 2, 1024>}, {pipeline_mode = #tpu.pipeline_mode<synchronous>, transform_indices = @transform_1, window_bounds = array<i64: 1024, 128>}, {pipeline_mode = #tpu.pipeline_mode<synchronous>, transform_indices = @transform_2, window_bounds = array<i64: 1, 128>}, {pipeline_mode = #tpu.pipeline_mode<synchronous>, transform_indices = @transform_3, window_bounds = array<i64: 128, 128>}, {pipeline_mode = #tpu.pipeline_mode<synchronous>, transform_indices = @transform_4, window_bounds = array<i64: 1, 128>}, {transform_indices = @transform_5, window_bounds = array<i64: 2, 128>}]} {
    %c0 = arith.constant 0 : index
    %c0_0 = arith.constant 0 : index
    %0 = vector.load %arg1[%c0, %c0_0] : memref<2x1024xf32, #tpu.memory_space<vmem>>, vector<2x1024xf32>
    %c0_1 = arith.constant 0 : index
    %c0_2 = arith.constant 0 : index
    %1 = vector.load %arg2[%c0_1, %c0_2] : memref<1024x128xf32, #tpu.memory_space<vmem>>, vector<1024x128xf32>
    %cst = arith.constant dense<0.000000e+00> : vector<2x128xf32>
    %2 = tpu.matmul %0, %1, %cst {dimension_numbers = #tpu.dot_dimension_numbers<[1], [0], [0], [1], [0, 0, 1, 1], [], []>} : vector<2x1024xf32>, vector<1024x128xf32>, vector<2x128xf32> -> vector<2x128xf32>
    %c0_3 = arith.constant 0 : index
    %c0_4 = arith.constant 0 : index
    %3 = vector.load %arg3[%c0_3, %c0_4] : memref<1x128xf32, #tpu.memory_space<vmem>>, vector<1x128xf32>
    %4 = vector.broadcast %3 : vector<1x128xf32> to vector<2x128xf32>
    %5 = arith.addf %2, %4 : vector<2x128xf32>
    %cst_5 = arith.constant 0.000000e+00 : f32
    %6 = vector.broadcast %cst_5 : f32 to vector<2x128xf32>
    %7 = arith.maximumf %5, %6 : vector<2x128xf32>
    %c0_6 = arith.constant 0 : index
    %c0_7 = arith.constant 0 : index
    %8 = vector.load %arg4[%c0_6, %c0_7] : memref<128x128xf32, #tpu.memory_space<vmem>>, vector<128x128xf32>
    %cst_8 = arith.constant dense<0.000000e+00> : vector<2x128xf32>
    %9 = tpu.matmul %7, %8, %cst_8 {dimension_numbers = #tpu.dot_dimension_numbers<[1], [0], [0], [1], [0, 0, 1, 1], [], []>} : vector<2x128xf32>, vector<128x128xf32>, vector<2x128xf32> -> vector<2x128xf32>
    %c0_9 = arith.constant 0 : index
    %c0_10 = arith.constant 0 : index
    %10 = vector.load %arg5[%c0_9, %c0_10] : memref<1x128xf32, #tpu.memory_space<vmem>>, vector<1x128xf32>
    %11 = vector.broadcast %10 : vector<1x128xf32> to vector<2x128xf32>
    %12 = arith.addf %9, %11 : vector<2x128xf32>
    %c0_11 = arith.constant 0 : index
    %c0_12 = arith.constant 0 : index
    %13 = vector.load %arg6[%c0_11, %c0_12] : memref<2x128xf32, #tpu.memory_space<vmem>>, vector<2x128xf32>
    tpu.vector_store %arg6[%c0_11, %c0_12], %12 {strides = array<i32>} : memref<2x128xf32, #tpu.memory_space<vmem>>, vector<2x128xf32>,
    return
  }
  func.func @transform_0(%arg0: i32) -> (i32, i32) {
    %c0_i32 = arith.constant 0 : i32
    %c0_i32_0 = arith.constant 0 : i32
    return %arg0, %c0_i32 : i32, i32
  }
  func.func @transform_1(%arg0: i32) -> (i32, i32) {
    %c0_i32 = arith.constant 0 : i32
    %c0_i32_0 = arith.constant 0 : i32
    %c0_i32_1 = arith.constant 0 : i32
    return %c0_i32, %c0_i32_0 : i32, i32
  }
  func.func @transform_2(%arg0: i32) -> (i32, i32) {
    %c0_i32 = arith.constant 0 : i32
    %c0_i32_0 = arith.constant 0 : i32
    %c0_i32_1 = arith.constant 0 : i32
    return %c0_i32, %c0_i32_0 : i32, i32
  }
  func.func @transform_3(%arg0: i32) -> (i32, i32) {
    %c0_i32 = arith.constant 0 : i32
    %c0_i32_0 = arith.constant 0 : i32
    %c0_i32_1 = arith.constant 0 : i32
    return %c0_i32, %c0_i32_0 : i32, i32
  }
  func.func @transform_4(%arg0: i32) -> (i32, i32) {
    %c0_i32 = arith.constant 0 : i32
    %c0_i32_0 = arith.constant 0 : i32
    %c0_i32_1 = arith.constant 0 : i32
    return %c0_i32, %c0_i32_0 : i32, i32
  }
  func.func @transform_5(%arg0: i32) -> (i32, i32) {
    %c0_i32 = arith.constant 0 : i32
    %c0_i32_0 = arith.constant 0 : i32
    return %arg0, %c0_i32 : i32, i32
  }
}

</mosaic_0001>

<bundles_post_ra>
// kernel: tpu_custom_call.1
= control target key start
LH: loop header
LB: loop body
LE: loop exit
PB: predicated region body
PF: predicated region fallthrough
CT: control target
= control target key end

     0   :  { %10 = vsyncpa [#allocation3], 0  ;;  %s986_s0 = inlined_call_operand.hbm [shape: f32[2,1024], index: 0, kind: input, shape index: {}]   ;;  %s987_s1 = inlined_call_operand.hbm [shape: f32[1024,128], index: 1, kind: input, shape index: {}]   ;;  %s988_s2 = inlined_call_operand.vmem [shape: f32[1,128], index: 2, kind: input, shape index: {}]   ;;  %s989_s3 = inlined_call_operand.hbm [shape: f32[128,128], index: 3, kind: input, shape index: {}]   ;;  %s990_s4 = inlined_call_operand.vmem [shape: f32[1,128], index: 4, kind: input, shape index: {}]   ;;  %s991_s5 = inlined_call_operand.hbm [shape: f32[2,128], index: 5, kind: output, shape index: {}]  }
   0x1   :  { %11 = vsyncpa [#allocation6], 0 }
   0x2   :  { %12 = vsyncpa [#allocation4], 0  ;;  %s923_s18 = smov [#allocation5]  }
   0x3   :  { %s28_s19 = sshll.u32 %s923_s18, 4  ;;  %s29_s19 = int_to_ptr.vmem [resolvable:$true] %s28_s19 }
   0x4   :  { %s845_s20 = scalar_lea.vmem %s29_s19, 16384  ;;  %p850_p1 = scmp.lt.s32.totalorder %s29_s19, %s29_s19 }
   0x5   :  { %p846_p0 = scmp.ne.s32.totalorder %s29_s19, %s845_s20  ;;  %p851_p2 = scmp.lt.s32.totalorder %s845_s20, %s845_s20 }
   0x7   :  { %p852_p3 = por %p851_p2, %p850_p1 }
   0x9   :  { %p853_p4 = pnand %p852_p3, %p846_p0 }
   0xb   :  { %856 = shalt.err (!%p853_p4)
}
   0xc   :  { %s924_s21 = smov 128   ;;  %s925_s22 = smov 8  }
   0xd   :  { %34 = dma.hbm_to_vmem [thread:$0]  %s987_s1, 16384, %s29_s19, [#allocation6], %s924_s21, %s924_s21, %s925_s22  }
   0xe   :  { %s926_s25 = smov [#allocation2]   ;;  %s927_s27 = smov [#allocation7]  }
   0xf   :  { %s19_s26 = sshll.u32 %s926_s25, 4  ;;  %s42_s28 = sshll.u32 %s927_s27, 4  ;;  %s20_s26 = int_to_ptr.vmem [resolvable:$true] %s19_s26  ;;  %s43_s28 = int_to_ptr.vmem [resolvable:$true] %s42_s28 }
  0x10   :  { %s865_s29 = scalar_lea.vmem %s20_s26, 256  ;;  %p870_p6 = scmp.lt.s32.totalorder %s20_s26, %s20_s26 }
  0x11   :  { %p866_p5 = scmp.ne.s32.totalorder %s20_s26, %s865_s29  ;;  %p871_p7 = scmp.lt.s32.totalorder %s865_s29, %s865_s29 }
  0x13   :  { %p872_p8 = por %p871_p7, %p870_p6 }
  0x15   :  { %p873_p9 = pnand %p872_p8, %p866_p5 }
  0x17   :  { %876 = shalt.err (!%p873_p9)
}
  0x18   :  { %22 = dma.hbm_to_vmem [thread:$0]  %s986_s0, 256, %s20_s26, [#allocation3]  }
  0x19   :  { %s885_s7 = scalar_lea.vmem %s43_s28, 2048  ;;  %p890_p11 = scmp.lt.s32.totalorder %s43_s28, %s43_s28 }
  0x1a   :  { %p886_p10 = scmp.ne.s32.totalorder %s43_s28, %s885_s7  ;;  %p891_p12 = scmp.lt.s32.totalorder %s885_s7, %s885_s7 }
  0x1c   :  { %p892_p13 = por %p891_p12, %p890_p11 }
  0x1e   :  { %p893_p0 = pnand %p892_p13, %p886_p10 }
  0x20   :  { %896 = shalt.err (!%p893_p0)
}
  0x21   :  { %48 = dma.hbm_to_vmem [thread:$0]  %s989_s3, 2048, %s43_s28, [#allocation6], %s924_s21, %s924_s21, %s925_s22  }
  0x22   :  { %917 = dma.done.wait [#allocation3], 256  }
  0x23   :  { %918 = vsyncadd [#allocation3], 4294967040 }
  0x24   :  { %919 = dma.done.wait [#allocation6], 18432  }
  0x25   :  { %920 = vsyncadd [#allocation6], 4294948864  ;;  %v93_v0 = vld [vmem:[#allocation5 + $0xf8] sm:$0xff]  ;;  %v92_v4 = vld [vmem:[#allocation5 + $0xf0] sm:$0xff]  ;;  %v928_v30 = vmov 1983009808   ;;  %v203_v32 = vlaneseq }
  0x26   :  { %v125_v1 = vld [vmem:[#allocation5 + $0x1f8] sm:$0xff]  ;;  %634 = vmatprep.subr.mxu0 %v93_v0  ;;  %v124_v5 = vld [vmem:[#allocation5 + $0x1f0] sm:$0xff]  ;;  %v91_v8 = vld [vmem:[#allocation5 + $0xe8] sm:$0xff]  ;;  %v201_v31 = vunpack.c.l.s4 %v928_v30  ;;  %vm930_vm0 = vmmov 0   ;;  %s931_s11 = smov [#allocation8]  }
  0x27   :  { %v77_v2 = vld [vmem:[#allocation5 + $0x78] sm:$0xff]  ;;  %669 = vmatprep.subr.mxu1 %v125_v1  ;;  %v76_v6 = vld [vmem:[#allocation5 + $0x70] sm:$0xff]  ;;  %v123_v9 = vld [vmem:[#allocation5 + $0x1e8] sm:$0xff]  ;;  %v204_v42 = vshrl.u32 %v203_v32, 7 }
  0x28   :  { %v109_v3 = vld [vmem:[#allocation5 + $0x178] sm:$0xff]  ;;  %635 = vmatpush3.msra.mxu0 %v77_v2  ;;  %v108_v7 = vld [vmem:[#allocation5 + $0x170] sm:$0xff]  ;;  %v75_v10 = vld [vmem:[#allocation5 + $0x68] sm:$0xff]  ;;  %v202_v41 = vunpack.c.0.s8 %v201_v31 }
  0x29   :  { %670 = vmatpush3.msra.mxu1 %v109_v3  ;;  %636 = vmatprep.subr.mxu0 %v92_v4  ;;  %v107_v11 = vld [vmem:[#allocation5 + $0x168] sm:$0xff]  ;;  %v90_v12 = vld [vmem:[#allocation5 + $0xe0] sm:$0xff]  ;;  %v89_v16 = vld [vmem:[#allocation5 + $0xd8] sm:$0xff] }
  0x2a   :  { %671 = vmatprep.subr.mxu1 %v124_v5  ;;  %637 = vmatpush3.msra.mxu0 %v76_v6  ;;  %v122_v13 = vld [vmem:[#allocation5 + $0x1e0] sm:$0xff]  ;;  %v121_v17 = vld [vmem:[#allocation5 + $0x1d8] sm:$0xff]  ;;  %v88_v20 = vld [vmem:[#allocation5 + $0xd0] sm:$0xff]  ;;  %v971_v51 = vsub.s32 %v202_v41, %v204_v42 }
  0x2b   :  { %672 = vmatpush3.msra.mxu1 %v108_v7  ;;  %638 = vmatprep.subr.mxu0 %v91_v8  ;;  %v74_v14 = vld [vmem:[#allocation5 + $0x60] sm:$0xff]  ;;  %v73_v18 = vld [vmem:[#allocation5 + $0x58] sm:$0xff]  ;;  %v120_v21 = vld [vmem:[#allocation5 + $0x1d0] sm:$0xff] }
  0x2c   :  { %673 = vmatprep.subr.mxu1 %v123_v9  ;;  %v106_v15 = vld [vmem:[#allocation5 + $0x160] sm:$0xff]  ;;  %639 = vmatpush3.msra.mxu0 %v75_v10  ;;  %v105_v19 = vld [vmem:[#allocation5 + $0x158] sm:$0xff]  ;;  %v72_v22 = vld [vmem:[#allocation5 + $0x50] sm:$0xff] }
  0x2d   :  { %674 = vmatpush3.msra.mxu1 %v107_v11  ;;  %640 = vmatprep.subr.mxu0 %v90_v12  ;;  %v104_v23 = vld [vmem:[#allocation5 + $0x150] sm:$0xff]  ;;  %v87_v24 = vld [vmem:[#allocation5 + $0xc8] sm:$0xff]  ;;  %v86_v28 = vld [vmem:[#allocation5 + $0xc0] sm:$0xff] }
  0x2e   :  { %675 = vmatprep.subr.mxu1 %v122_v13  ;;  %641 = vmatpush3.msra.mxu0 %v74_v14  ;;  %v119_v25 = vld [vmem:[#allocation5 + $0x1c8] sm:$0xff]  ;;  %v118_v29 = vld [vmem:[#allocation5 + $0x1c0] sm:$0xff]  ;;  %v85_v35 = vld [vmem:[#allocation5 + $0xb8] sm:$0xff] }
  0x2f   :  { %676 = vmatpush3.msra.mxu1 %v106_v15  ;;  %642 = vmatprep.subr.mxu0 %v89_v16  ;;  %v71_v26 = vld [vmem:[#allocation5 + $0x48] sm:$0xff]  ;;  %v70_v33 = vld [vmem:[#allocation5 + $0x40] sm:$0xff]  ;;  %v117_v36 = vld [vmem:[#allocation5 + $0x1b8] sm:$0xff] }
  0x30   :  { %677 = vmatprep.subr.mxu1 %v121_v17  ;;  %643 = vmatpush3.msra.mxu0 %v73_v18  ;;  %v103_v27 = vld [vmem:[#allocation5 + $0x148] sm:$0xff]  ;;  %v102_v34 = vld [vmem:[#allocation5 + $0x140] sm:$0xff]  ;;  %v69_v37 = vld [vmem:[#allocation5 + $0x38] sm:$0xff] }
  0x31   :  { %678 = vmatpush3.msra.mxu1 %v105_v19  ;;  %644 = vmatprep.subr.mxu0 %v88_v20  ;;  %v101_v38 = vld [vmem:[#allocation5 + $0x138] sm:$0xff]  ;;  %v84_v39 = vld [vmem:[#allocation5 + $0xb0] sm:$0xff]  ;;  %v83_v45 = vld [vmem:[#allocation5 + $0xa8] sm:$0xff] }
  0x32   :  { %679 = vmatprep.subr.mxu1 %v120_v21  ;;  %645 = vmatpush3.msra.mxu0 %v72_v22  ;;  %v116_v40 = vld [vmem:[#allocation5 + $0x1b0] sm:$0xff]  ;;  %v115_v46 = vld [vmem:[#allocation5 + $0x1a8] sm:$0xff]  ;;  %v82_v49 = vld [vmem:[#allocation5 + $0xa0] sm:$0xff] }
  0x33   :  { %680 = vmatpush3.msra.mxu1 %v104_v23  ;;  %646 = vmatprep.subr.mxu0 %v87_v24  ;;  %v68_v43 = vld [vmem:[#allocation5 + $0x30] sm:$0xff]  ;;  %v67_v47 = vld [vmem:[#allocation5 + $0x28] sm:$0xff]  ;;  %v114_v50 = vld [vmem:[#allocation5 + $0x1a0] sm:$0xff] }
  0x34   :  { %681 = vmatprep.subr.mxu1 %v119_v25  ;;  %647 = vmatpush3.msra.mxu0 %v71_v26  ;;  %v100_v44 = vld [vmem:[#allocation5 + $0x130] sm:$0xff]  ;;  %v99_v48 = vld [vmem:[#allocation5 + $0x128] sm:$0xff]  ;;  %v66_v52 = vld [vmem:[#allocation5 + $0x20] sm:$0xff] }
  0x35   :  { %682 = vmatpush3.msra.mxu1 %v103_v27  ;;  %648 = vmatprep.subr.mxu0 %v86_v28  ;;  %v98_v53 = vld [vmem:[#allocation5 + $0x120] sm:$0xff]  ;;  %v60_v54 = vld [vmem:[#allocation2] sm:$0xff]  ;;  %v81_v55 = vld [vmem:[#allocation5 + $0x98] sm:$0xff] }
  0x36   :  { %683 = vmatprep.subr.mxu1 %v118_v29  ;;  %649 = vmatpush3.msra.mxu0 %v70_v33  ;;  %v113_v56 = vld [vmem:[#allocation5 + $0x198] sm:$0xff]  ;;  %v199_v57 = vcombine.high %v60_v54, %v60_v54  ;;  %v80_v60 = vld [vmem:[#allocation5 + $0x90] sm:$0xff]  ;;  %v206_v62 = vrot.slane %v60_v54, %v971_v51  ;;  %v79_v1 = vld [vmem:[#allocation5 + $0x88] sm:$0xff] }
  0x37   :  { %684 = vmatpush3.msra.mxu1 %v102_v34  ;;  %650 = vmatprep.subr.mxu0 %v85_v35  ;;  %v65_v58 = vld [vmem:[#allocation5 + $0x18] sm:$0xff]  ;;  %v112_v61 = vld [vmem:[#allocation5 + $0x190] sm:$0xff]  ;;  %v111_v2 = vld [vmem:[#allocation5 + $0x188] sm:$0xff] }
  0x38   :  { %685 = vmatprep.subr.mxu1 %v117_v36  ;;  %651 = vmatpush3.msra.mxu0 %v69_v37  ;;  %v97_v59 = vld [vmem:[#allocation5 + $0x118] sm:$0xff]  ;;  %v64_v63 = vld [vmem:[#allocation5 + $0x10] sm:$0xff]  ;;  %v213_v3 = vrot.slane %v199_v57, %v971_v51  ;;  %v63_v4 = vld [vmem:[#allocation5 + $0x8] sm:$0xff]  ;;  %v214_v8 = vcombine.high %v206_v62, %v206_v62 }
  0x39   :  { %686 = vmatpush3.msra.mxu1 %v101_v38  ;;  %652 = vmatprep.subr.mxu0 %v84_v39  ;;  %v96_v0 = vld [vmem:[#allocation5 + $0x110] sm:$0xff]  ;;  %v95_v5 = vld [vmem:[#allocation5 + $0x108] sm:$0xff]  ;;  %v78_v6 = vld [vmem:[#allocation5 + $0x80] sm:$0xff] }
  0x3a   :  { %687 = vmatprep.subr.mxu1 %v116_v40  ;;  %653 = vmatpush3.msra.mxu0 %v68_v43  ;;  %v110_v7 = vld [vmem:[#allocation5 + $0x180] sm:$0xff]  ;;  %v215_v11 = vcombine.high %v213_v3, %v213_v3  ;;  %v157_v12 = vld [vmem:[#allocation5 + $0x2f8] sm:$0xff]  ;;  %v156_v16 = vld [vmem:[#allocation5 + $0x2f0] sm:$0xff] }
  0x3b   :  { %688 = vmatpush3.msra.mxu1 %v100_v44  ;;  %654 = vmatprep.subr.mxu0 %v83_v45  ;;  %v62_v9 = vld [vmem:[#allocation5] sm:$0xff]  ;;  %v189_v13 = vld [vmem:[#allocation5 + $0x3f8] sm:$0xff]  ;;  %v188_v17 = vld [vmem:[#allocation5 + $0x3f0] sm:$0xff] }
  0x3c   :  { %689 = vmatprep.subr.mxu1 %v115_v46  ;;  %655 = vmatpush3.msra.mxu0 %v67_v47  ;;  %v94_v10 = vld [vmem:[#allocation5 + $0x100] sm:$0xff]  ;;  %v141_v14 = vld [vmem:[#allocation5 + $0x278] sm:$0xff]  ;;  %v140_v18 = vld [vmem:[#allocation5 + $0x270] sm:$0xff] }
  0x3d   :  { %690 = vmatpush3.msra.mxu1 %v99_v48  ;;  %656 = vmatprep.subr.mxu0 %v82_v49  ;;  %v173_v15 = vld [vmem:[#allocation5 + $0x378] sm:$0xff]  ;;  %v172_v19 = vld [vmem:[#allocation5 + $0x370] sm:$0xff]  ;;  %v155_v20 = vld [vmem:[#allocation5 + $0x2e8] sm:$0xff] }
  0x3e   :  { %691 = vmatprep.subr.mxu1 %v114_v50  ;;  %657 = vmatpush3.msra.mxu0 %v66_v52  ;;  %v187_v21 = vld [vmem:[#allocation5 + $0x3e8] sm:$0xff]  ;;  %v154_v24 = vld [vmem:[#allocation5 + $0x2e0] sm:$0xff]  ;;  %v153_v28 = vld [vmem:[#allocation5 + $0x2d8] sm:$0xff] }
  0x3f   :  { %692 = vmatpush3.msra.mxu1 %v98_v53  ;;  %658 = vmatprep.subr.mxu0 %v81_v55  ;;  %v139_v22 = vld [vmem:[#allocation5 + $0x268] sm:$0xff]  ;;  %v186_v25 = vld [vmem:[#allocation5 + $0x3e0] sm:$0xff]  ;;  %v185_v29 = vld [vmem:[#allocation5 + $0x3d8] sm:$0xff] }
  0x40   :  { %693 = vmatprep.subr.mxu1 %v113_v56  ;;  %659 = vmatpush3.msra.mxu0 %v65_v58  ;;  %v171_v23 = vld [vmem:[#allocation5 + $0x368] sm:$0xff]  ;;  %v138_v26 = vld [vmem:[#allocation5 + $0x260] sm:$0xff]  ;;  %v137_v30 = vld [vmem:[#allocation5 + $0x258] sm:$0xff] }
  0x41   :  { %694 = vmatpush3.msra.mxu1 %v97_v59  ;;  %660 = vmatprep.subr.mxu0 %v80_v60  ;;  %v170_v27 = vld [vmem:[#allocation5 + $0x360] sm:$0xff]  ;;  %v169_v31 = vld [vmem:[#allocation5 + $0x358] sm:$0xff]  ;;  %v152_v32 = vld [vmem:[#allocation5 + $0x2d0] sm:$0xff] }
  0x42   :  { %695 = vmatprep.subr.mxu1 %v112_v61  ;;  %661 = vmatpush3.msra.mxu0 %v64_v63  ;;  %v184_v33 = vld [vmem:[#allocation5 + $0x3d0] sm:$0xff]  ;;  %v151_v36 = vld [vmem:[#allocation5 + $0x2c8] sm:$0xff]  ;;  %v150_v40 = vld [vmem:[#allocation5 + $0x2c0] sm:$0xff] }
  0x43   :  { %696 = vmatpush3.msra.mxu1 %v96_v0  ;;  %662 = vmatprep.subr.mxu0 %v79_v1  ;;  %v136_v34 = vld [vmem:[#allocation5 + $0x250] sm:$0xff]  ;;  %v183_v37 = vld [vmem:[#allocation5 + $0x3c8] sm:$0xff]  ;;  %v182_v41 = vld [vmem:[#allocation5 + $0x3c0] sm:$0xff] }
  0x44   :  { %697 = vmatprep.subr.mxu1 %v111_v2  ;;  %663 = vmatpush3.msra.mxu0 %v63_v4  ;;  %v168_v35 = vld [vmem:[#allocation5 + $0x350] sm:$0xff]  ;;  %v135_v38 = vld [vmem:[#allocation5 + $0x248] sm:$0xff]  ;;  %v134_v42 = vld [vmem:[#allocation5 + $0x240] sm:$0xff] }
  0x45   :  { %698 = vmatpush3.msra.mxu1 %v95_v5  ;;  %664 = vmatprep.subr.mxu0 %v78_v6  ;;  %v167_v39 = vld [vmem:[#allocation5 + $0x348] sm:$0xff]  ;;  %v166_v43 = vld [vmem:[#allocation5 + $0x340] sm:$0xff]  ;;  %v149_v44 = vld [vmem:[#allocation5 + $0x2b8] sm:$0xff] }
  0x46   :  { %699 = vmatprep.subr.mxu1 %v110_v7  ;;  %665 = vmatpush3.msra.mxu0 %v62_v9  ;;  %v181_v45 = vld [vmem:[#allocation5 + $0x3b8] sm:$0xff]  ;;  %v148_v48 = vld [vmem:[#allocation5 + $0x2b0] sm:$0xff]  ;;  %v147_v53 = vld [vmem:[#allocation5 + $0x2a8] sm:$0xff] }
  0x47   :  { %305 = vmatprep.mubr.f32.mxu0 %v214_v8  ;;  %700 = vmatpush3.msra.mxu1 %v94_v10  ;;  %v133_v46 = vld [vmem:[#allocation5 + $0x238] sm:$0xff]  ;;  %v180_v49 = vld [vmem:[#allocation5 + $0x3b0] sm:$0xff]  ;;  %v179_v54 = vld [vmem:[#allocation5 + $0x3a8] sm:$0xff] }
  0x48   :  { %306 = vmatmul.mubr.f32.vlgmr.msra.gmra.mxu0 %v206_v62  ;;  %375 = vmatprep.mubr.f32.mxu1 %v215_v11  ;;  %v165_v47 = vld [vmem:[#allocation5 + $0x338] sm:$0xff]  ;;  %v132_v50 = vld [vmem:[#allocation5 + $0x230] sm:$0xff]  ;;  %v131_v56 = vld [vmem:[#allocation5 + $0x228] sm:$0xff] }
  0x49   :  { %704 = vmatprep.subr.mxu0 %v157_v12  ;;  %739 = vmatprep.subr.mxu1 %v189_v13  ;;  %v164_v52 = vld [vmem:[#allocation5 + $0x330] sm:$0xff]  ;;  %v61_v55 = vld [vmem:[#allocation2 + $0x8] sm:$0xff]  ;;  %v163_v57 = vld [vmem:[#allocation5 + $0x328] sm:$0xff] }
  0x4a   :  { %376 = vmatmul.mubr.f32.vlgmr.msra.gmra.mxu1 %v213_v3  ;;  %705 = vmatpush3.msra.mxu0 %v141_v14  ;;  %v146_v58 = vld [vmem:[#allocation5 + $0x2a0] sm:$0xff]  ;;  %v216_v62 = vcombine.high %v61_v55, %v61_v55  ;;  %v145_v63 = vld [vmem:[#allocation5 + $0x298] sm:$0xff]  ;;  %v144_v3 = vld [vmem:[#allocation5 + $0x290] sm:$0xff]  ;;  %v223_v5 = vrot.slane %v61_v55, %v971_v51 }
  0x4b   :  { %740 = vmatpush3.msra.mxu1 %v173_v15  ;;  %706 = vmatprep.subr.mxu0 %v156_v16  ;;  %v178_v59 = vld [vmem:[#allocation5 + $0x3a0] sm:$0xff]  ;;  %v177_v0 = vld [vmem:[#allocation5 + $0x398] sm:$0xff]  ;;  %v176_v4 = vld [vmem:[#allocation5 + $0x390] sm:$0xff] }
  0x4c   :  { %741 = vmatprep.subr.mxu1 %v188_v17  ;;  %707 = vmatpush3.msra.mxu0 %v140_v18  ;;  %v130_v60 = vld [vmem:[#allocation5 + $0x220] sm:$0xff]  ;;  %v129_v1 = vld [vmem:[#allocation5 + $0x218] sm:$0xff]  ;;  %v128_v6 = vld [vmem:[#allocation5 + $0x210] sm:$0xff]  ;;  %v230_v8 = vrot.slane %v216_v62, %v971_v51  ;;  %v231_v15 = vcombine.high %v223_v5, %v223_v5 }
  0x4d   :  { %742 = vmatpush3.msra.mxu1 %v172_v19  ;;  %708 = vmatprep.subr.mxu0 %v155_v20  ;;  %v162_v61 = vld [vmem:[#allocation5 + $0x320] sm:$0xff]  ;;  %v161_v2 = vld [vmem:[#allocation5 + $0x318] sm:$0xff]  ;;  %v160_v7 = vld [vmem:[#allocation5 + $0x310] sm:$0xff]  ;;  %v929_v19 = vmov 0.0  }
  0x4e   :  { %743 = vmatprep.subr.mxu1 %v187_v21  ;;  %709 = vmatpush3.msra.mxu0 %v139_v22  ;;  %v143_v9 = vld [vmem:[#allocation5 + $0x288] sm:$0xff]  ;;  %v142_v13 = vld [vmem:[#allocation5 + $0x280] sm:$0xff]  ;;  %v232_v17 = vcombine.high %v230_v8, %v230_v8  ;;  %v537_v18 = vld [vmem:[#allocation7 + $0x78] sm:$0xff] }
  0x4f   :  { %744 = vmatpush3.msra.mxu1 %v171_v23  ;;  %710 = vmatprep.subr.mxu0 %v154_v24  ;;  %v175_v10 = vld [vmem:[#allocation5 + $0x388] sm:$0xff]  ;;  %v174_v14 = vld [vmem:[#allocation5 + $0x380] sm:$0xff]  ;;  %v536_v20 = vld [vmem:[#allocation7 + $0x70] sm:$0xff] }
  0x50   :  { %745 = vmatprep.subr.mxu1 %v186_v25  ;;  %711 = vmatpush3.msra.mxu0 %v138_v26  ;;  %v127_v11 = vld [vmem:[#allocation5 + $0x208] sm:$0xff]  ;;  %v126_v16 = vld [vmem:[#allocation5 + $0x200] sm:$0xff]  ;;  %v533_v23 = vld [vmem:[#allocation7 + $0x58] sm:$0xff] }
  0x51   :  { %746 = vmatpush3.msra.mxu1 %v170_v27  ;;  %712 = vmatprep.subr.mxu0 %v153_v28  ;;  %v159_v12 = vld [vmem:[#allocation5 + $0x308] sm:$0xff]  ;;  %v158_v51 = vld [vmem:[#allocation5 + $0x300] sm:$0xff]  ;;  %v532_v24 = vld [vmem:[#allocation7 + $0x50] sm:$0xff] }
  0x52   :  { %747 = vmatprep.subr.mxu1 %v185_v29  ;;  %713 = vmatpush3.msra.mxu0 %v137_v30  ;;  %v535_v21 = vld [vmem:[#allocation7 + $0x68] sm:$0xff]  ;;  %v534_v22 = vld [vmem:[#allocation7 + $0x60] sm:$0xff]  ;;  %v529_v27 = vld [vmem:[#allocation7 + $0x38] sm:$0xff] }
  0x53   :  { %748 = vmatpush3.msra.mxu1 %v169_v31  ;;  %714 = vmatprep.subr.mxu0 %v152_v32  ;;  %v531_v25 = vld [vmem:[#allocation7 + $0x48] sm:$0xff]  ;;  %v530_v26 = vld [vmem:[#allocation7 + $0x40] sm:$0xff]  ;;  %v528_v28 = vld [vmem:[#allocation7 + $0x30] sm:$0xff] }
  0x54   :  { %749 = vmatprep.subr.mxu1 %v184_v33  ;;  %715 = vmatpush3.msra.mxu0 %v136_v34  ;;  %v527_v29 = vld [vmem:[#allocation7 + $0x28] sm:$0xff]  ;;  %v526_v30 = vld [vmem:[#allocation7 + $0x20] sm:$0xff]  ;;  %v525_v31 = vld [vmem:[#allocation7 + $0x18] sm:$0xff] }
  0x55   :  { %750 = vmatpush3.msra.mxu1 %v168_v35  ;;  %716 = vmatprep.subr.mxu0 %v151_v36  ;;  %v524_v32 = vld [vmem:[#allocation7 + $0x10] sm:$0xff]  ;;  %v523_v33 = vld [vmem:[#allocation7 + $0x8] sm:$0xff]  ;;  %v522_v34 = vld [vmem:[#allocation7] sm:$0xff] }
  0x56   :  { %751 = vmatprep.subr.mxu1 %v183_v37  ;;  %717 = vmatpush3.msra.mxu0 %v135_v38 }
  0x57   :  { %752 = vmatpush3.msra.mxu1 %v167_v39  ;;  %718 = vmatprep.subr.mxu0 %v150_v40  ;;  %v632_v39 = vld [vmem:[%s988_s2] ss:$0 sm:$0xff]  ;;  %s622_s2 = sshll.u32 %s931_s11, 4  ;;  %s623_s2 = int_to_ptr.vmem [resolvable:$true] %s622_s2 }
  0x58   :  { %753 = vmatprep.subr.mxu1 %v182_v41  ;;  %719 = vmatpush3.msra.mxu0 %v134_v42  ;;  %s897_s12 = scalar_lea.vmem %s623_s2, 32  ;;  %p902_p2 = scmp.lt.s32.totalorder %s623_s2, %s623_s2 }
  0x59   :  { %754 = vmatpush3.msra.mxu1 %v166_v43  ;;  %720 = vmatprep.subr.mxu0 %v149_v44  ;;  %p898_p1 = scmp.ne.s32.totalorder %s623_s2, %s897_s12  ;;  %p903_p3 = scmp.lt.s32.totalorder %s897_s12, %s897_s12 }
  0x5a   :  { %755 = vmatprep.subr.mxu1 %v181_v45  ;;  %721 = vmatpush3.msra.mxu0 %v133_v46 }
  0x5b   :  { %756 = vmatpush3.msra.mxu1 %v165_v47  ;;  %722 = vmatprep.subr.mxu0 %v148_v48  ;;  %p904_p4 = por %p903_p3, %p902_p2 }
  0x5c   :  { %757 = vmatprep.subr.mxu1 %v180_v49  ;;  %723 = vmatpush3.msra.mxu0 %v132_v50 }
  0x5d   :  { %758 = vmatpush3.msra.mxu1 %v164_v52  ;;  %724 = vmatprep.subr.mxu0 %v147_v53  ;;  %p905_p5 = pnand %p904_p4, %p898_p1 }
  0x5e   :  { %759 = vmatprep.subr.mxu1 %v179_v54  ;;  %725 = vmatpush3.msra.mxu0 %v131_v56  ;;  %v633_v54 = vld [vmem:[%s990_s4] ss:$0 sm:$0xff] }
  0x5f   :  { %760 = vmatpush3.msra.mxu1 %v163_v57  ;;  %726 = vmatprep.subr.mxu0 %v146_v58 }
  0x60   :  { %761 = vmatprep.subr.mxu1 %v178_v59  ;;  %727 = vmatpush3.msra.mxu0 %v130_v60 }
  0x61   :  { %762 = vmatpush3.msra.mxu1 %v162_v61  ;;  %728 = vmatprep.subr.mxu0 %v145_v63 }
  0x62   :  { %763 = vmatprep.subr.mxu1 %v177_v0  ;;  %729 = vmatpush3.msra.mxu0 %v129_v1 }
  0x63   :  { %764 = vmatpush3.msra.mxu1 %v161_v2  ;;  %730 = vmatprep.subr.mxu0 %v144_v3 }
  0x64   :  { %765 = vmatprep.subr.mxu1 %v176_v4  ;;  %731 = vmatpush3.msra.mxu0 %v128_v6 }
  0x65   :  { %766 = vmatpush3.msra.mxu1 %v160_v7  ;;  %732 = vmatprep.subr.mxu0 %v143_v9 }
  0x66   :  { %767 = vmatprep.subr.mxu1 %v175_v10  ;;  %733 = vmatpush3.msra.mxu0 %v127_v11 }
  0x67   :  { %768 = vmatpush3.msra.mxu1 %v159_v12  ;;  %734 = vmatprep.subr.mxu0 %v142_v13 }
  0x68   :  { %769 = vmatprep.subr.mxu1 %v174_v14  ;;  %735 = vmatpush3.msra.mxu0 %v126_v16 }
  0x69   :  { %445 = vmatprep.mubr.f32.mxu0 %v231_v15  ;;  %770 = vmatpush3.msra.mxu1 %v158_v51 }
  0x6a   :  { %515 = vmatprep.mubr.f32.mxu1 %v232_v17  ;;  %446 = vmatmul.mubr.f32.vlgmr.msra.gmra.mxu0 %v223_v5 }
  0x6b   :  { %516 = vmatmul.mubr.f32.vlgmr.msra.gmra.mxu1 %v230_v8  ;;  %791 = vmatprep.subr.mxu0 %v929_v19 }
  0x6c   :  { %792 = vmatpush3.msra.mxu0 %v537_v18  ;;  %823 = vmatprep.mubr.msk.f32.mxu0 %vm930_vm0, %v929_v19 }
  0x6d   :  { %793 = vmatprep.subr.mxu0 %v929_v19 }
  0x6e   :  { %794 = vmatpush3.msra.mxu0 %v536_v20 }
  0x6f   :  { %795 = vmatprep.subr.mxu0 %v929_v19 }
  0x70   :  { %796 = vmatpush3.msra.mxu0 %v535_v21 }
  0x71   :  { %797 = vmatprep.subr.mxu0 %v929_v19 }
  0x72   :  { %798 = vmatpush3.msra.mxu0 %v534_v22 }
  0x73   :  { %799 = vmatprep.subr.mxu0 %v929_v19 }
  0x74   :  { %800 = vmatpush3.msra.mxu0 %v533_v23 }
  0x75   :  { %801 = vmatprep.subr.mxu0 %v929_v19 }
  0x76   :  { %802 = vmatpush3.msra.mxu0 %v532_v24 }
  0x77   :  { %803 = vmatprep.subr.mxu0 %v929_v19 }
  0x78   :  { %804 = vmatpush3.msra.mxu0 %v531_v25 }
  0x79   :  { %805 = vmatprep.subr.mxu0 %v929_v19 }
  0x7a   :  { %806 = vmatpush3.msra.mxu0 %v530_v26 }
  0x7b   :  { %807 = vmatprep.subr.mxu0 %v929_v19 }
  0x7c   :  { %808 = vmatpush3.msra.mxu0 %v529_v27 }
  0x7d   :  { %809 = vmatprep.subr.mxu0 %v929_v19 }
  0x7e   :  { %810 = vmatpush3.msra.mxu0 %v528_v28 }
  0x7f   :  { %811 = vmatprep.subr.mxu0 %v929_v19 }
  0x80   :  { %812 = vmatpush3.msra.mxu0 %v527_v29 }
  0x81   :  { %813 = vmatprep.subr.mxu0 %v929_v19 }
  0x82   :  { %814 = vmatpush3.msra.mxu0 %v526_v30 }
  0x83   :  { %815 = vmatprep.subr.mxu0 %v929_v19 }
  0x84   :  { %816 = vmatpush3.msra.mxu0 %v525_v31 }
  0x85   :  { %817 = vmatprep.subr.mxu0 %v929_v19 }
  0x86   :  { %818 = vmatpush3.msra.mxu0 %v524_v32 }
  0x87   :  { %819 = vmatprep.subr.mxu0 %v929_v19 }
  0x88   :  { %820 = vmatpush3.msra.mxu0 %v523_v33 }
  0x89   :  { %821 = vmatprep.subr.mxu0 %v929_v19 }
  0x8a   :  { %822 = vmatpush3.msra.mxu0 %v522_v34 }
 0x108   :  { %v666_v35 = vpop.f32.mrf.mxu0 }
 0x10a   :  { %v701_v36 = vpop.f32.mrf.mxu1  ;;  %v667_v37 = vpop.f32.mrf.mxu0 }
 0x10b   :  { %v668_v38 = vadd.f32 %v667_v37, %v666_v35 }
 0x10c   :  { %v702_v40 = vpop.f32.mrf.mxu1 }
 0x10d   :  { %v308_v41 = vadd.f32 %v668_v38, %v632_v39  ;;  %v703_v42 = vadd.f32 %v702_v40, %v701_v36 }
 0x10f   :  { %v378_v47 = vadd.f32 %v703_v42, %v308_v41 }
 0x12a   :  { %v736_v43 = vpop.f32.mrf.mxu0 }
 0x12b   :  { %v771_v44 = vpop.f32.mrf.mxu1 }
 0x12c   :  { %v737_v45 = vpop.f32.mrf.mxu0 }
 0x12d   :  { %v772_v46 = vpop.f32.mrf.mxu1  ;;  %v738_v48 = vadd.f32 %v737_v45, %v736_v43 }
 0x12e   :  { %v773_v50 = vadd.f32 %v772_v46, %v771_v44 }
 0x12f   :  { %v448_v49 = vadd.f32 %v738_v48, %v378_v47 }
 0x131   :  { %v518_v52 = vadd.f32 %v773_v50, %v448_v49 }
 0x133   :  { %v521_v53 = vmax.f32 %v518_v52, 0.0 }
 0x135   :  { %824 = vmatmul.mubr.f32.vlgmr.msra.gmra.mxu0 %v521_v53 }
 0x1f5   :  { %v611_v55 = vpop.f32.mrf.mxu0 }
 0x1f6   :  { %v612_v56 = vadd.f32 %v633_v54, %v611_v55 }
 0x1f7   :  { %v825_v57 = vpop.f32.mrf.mxu0 }
 0x1f8   :  { %615 = vst [vmem:[#allocation8] sm:$0x3] %v612_v56 }
 0x1f9   :  { %908 = shalt.err (!%p905_p5)
}
 0x1fa   :  { %625 = dma.vmem_to_hbm [thread:$0]  %s623_s2, 32, %s991_s5, [#allocation4]  }
 0x1fb   :  { %921 = dma.done.wait [#allocation4], 32  }
 0x1fc   :  { %922 = vsyncadd [#allocation4], 4294967264 }
 0x1fd   :  { %629 = vsyncpa [#allocation3], 1 }
 0x1fe   :  { %630 = vsyncpa [#allocation6], 1 }
 0x1ff   :  { %631 = vsyncpa [#allocation4], 1 }

// kernel: tpu_custom_call.1
= control target key start
LH: loop header
LB: loop body
LE: loop exit
PB: predicated region body
PF: predicated region fallthrough
CT: control target
= control target key end

     0   :  { %10 = vsyncpa [#allocation3], 0  ;;  %s986_s0 = inlined_call_operand.hbm [shape: f32[2,1024], index: 0, kind: input, shape index: {}]   ;;  %s987_s1 = inlined_call_operand.hbm [shape: f32[1024,128], index: 1, kind: input, shape index: {}]   ;;  %s988_s2 = inlined_call_operand.vmem [shape: f32[1,128], index: 2, kind: input, shape index: {}]   ;;  %s989_s3 = inlined_call_operand.hbm [shape: f32[128,128], index: 3, kind: input, shape index: {}]   ;;  %s990_s4 = inlined_call_operand.vmem [shape: f32[1,128], index: 4, kind: input, shape index: {}]   ;;  %s991_s5 = inlined_call_operand.hbm [shape: f32[2,128], index: 5, kind: output, shape index: {}]  }
   0x1   :  { %11 = vsyncpa [#allocation6], 0 }
   0x2   :  { %12 = vsyncpa [#allocation4], 0  ;;  %s923_s18 = smov [#allocation5]  }
   0x3   :  { %s28_s19 = sshll.u32 %s923_s18, 4  ;;  %s29_s19 = int_to_ptr.vmem [resolvable:$true] %s28_s19 }
   0x4   :  { %s845_s20 = scalar_lea.vmem %s29_s19, 16384  ;;  %p850_p1 = scmp.lt.s32.totalorder %s29_s19, %s29_s19 }
   0x5   :  { %p846_p0 = scmp.ne.s32.totalorder %s29_s19, %s845_s20  ;;  %p851_p2 = scmp.lt.s32.totalorder %s845_s20, %s845_s20 }
   0x7   :  { %p852_p3 = por %p851_p2, %p850_p1 }
   0x9   :  { %p853_p4 = pnand %p852_p3, %p846_p0 }
   0xb   :  { %856 = shalt.err (!%p853_p4)
}
   0xc   :  { %s924_s21 = smov 128   ;;  %s925_s22 = smov 8  }
   0xd   :  { %34 = dma.hbm_to_vmem [thread:$0]  %s987_s1, 16384, %s29_s19, [#allocation6], %s924_s21, %s924_s21, %s925_s22  }
   0xe   :  { %s926_s25 = smov [#allocation2]   ;;  %s927_s27 = smov [#allocation7]  }
   0xf   :  { %s19_s26 = sshll.u32 %s926_s25, 4  ;;  %s42_s28 = sshll.u32 %s927_s27, 4  ;;  %s20_s26 = int_to_ptr.vmem [resolvable:$true] %s19_s26  ;;  %s43_s28 = int_to_ptr.vmem [resolvable:$true] %s42_s28 }
  0x10   :  { %s865_s29 = scalar_lea.vmem %s20_s26, 256  ;;  %p870_p6 = scmp.lt.s32.totalorder %s20_s26, %s20_s26 }
  0x11   :  { %p866_p5 = scmp.ne.s32.totalorder %s20_s26, %s865_s29  ;;  %p871_p7 = scmp.lt.s32.totalorder %s865_s29, %s865_s29 }
  0x13   :  { %p872_p8 = por %p871_p7, %p870_p6 }
  0x15   :  { %p873_p9 = pnand %p872_p8, %p866_p5 }
  0x17   :  { %876 = shalt.err (!%p873_p9)
}
  0x18   :  { %22 = dma.hbm_to_vmem [thread:$0]  %s986_s0, 256, %s20_s26, [#allocation3]  }
  0x19   :  { %s885_s7 = scalar_lea.vmem %s43_s28, 2048  ;;  %p890_p11 = scmp.lt.s32.totalorder %s43_s28, %s43_s28 }
  0x1a   :  { %p886_p10 = scmp.ne.s32.totalorder %s43_s28, %s885_s7  ;;  %p891_p12 = scmp.lt.s32.totalorder %s885_s7, %s885_s7 }
  0x1c   :  { %p892_p13 = por %p891_p12, %p890_p11 }
  0x1e   :  { %p893_p0 = pnand %p892_p13, %p886_p10 }
  0x20   :  { %896 = shalt.err (!%p893_p0)
}
  0x21   :  { %48 = dma.hbm_to_vmem [thread:$0]  %s989_s3, 2048, %s43_s28, [#allocation6], %s924_s21, %s924_s21, %s925_s22  }
  0x22   :  { %917 = dma.done.wait [#allocation3], 256  }
  0x23   :  { %918 = vsyncadd [#allocation3], 4294967040 }
  0x24   :  { %919 = dma.done.wait [#allocation6], 18432  }
  0x25   :  { %920 = vsyncadd [#allocation6], 4294948864  ;;  %v93_v0 = vld [vmem:[#allocation5 + $0xf8] sm:$0xff]  ;;  %v92_v4 = vld [vmem:[#allocation5 + $0xf0] sm:$0xff]  ;;  %v928_v30 = vmov 1983009808   ;;  %v203_v32 = vlaneseq }
  0x26   :  { %v125_v1 = vld [vmem:[#allocation5 + $0x1f8] sm:$0xff]  ;;  %634 = vmatprep.subr.mxu0 %v93_v0  ;;  %v124_v5 = vld [vmem:[#allocation5 + $0x1f0] sm:$0xff]  ;;  %v91_v8 = vld [vmem:[#allocation5 + $0xe8] sm:$0xff]  ;;  %v201_v31 = vunpack.c.l.s4 %v928_v30  ;;  %vm930_vm0 = vmmov 0   ;;  %s931_s11 = smov [#allocation8]  }
  0x27   :  { %v77_v2 = vld [vmem:[#allocation5 + $0x78] sm:$0xff]  ;;  %669 = vmatprep.subr.mxu1 %v125_v1  ;;  %v76_v6 = vld [vmem:[#allocation5 + $0x70] sm:$0xff]  ;;  %v123_v9 = vld [vmem:[#allocation5 + $0x1e8] sm:$0xff]  ;;  %v204_v42 = vshrl.u32 %v203_v32, 7 }
  0x28   :  { %v109_v3 = vld [vmem:[#allocation5 + $0x178] sm:$0xff]  ;;  %635 = vmatpush3.msra.mxu0 %v77_v2  ;;  %v108_v7 = vld [vmem:[#allocation5 + $0x170] sm:$0xff]  ;;  %v75_v10 = vld [vmem:[#allocation5 + $0x68] sm:$0xff]  ;;  %v202_v41 = vunpack.c.0.s8 %v201_v31 }
  0x29   :  { %670 = vmatpush3.msra.mxu1 %v109_v3  ;;  %636 = vmatprep.subr.mxu0 %v92_v4  ;;  %v107_v11 = vld [vmem:[#allocation5 + $0x168] sm:$0xff]  ;;  %v90_v12 = vld [vmem:[#allocation5 + $0xe0] sm:$0xff]  ;;  %v89_v16 = vld [vmem:[#allocation5 + $0xd8] sm:$0xff] }
  0x2a   :  { %671 = vmatprep.subr.mxu1 %v124_v5  ;;  %637 = vmatpush3.msra.mxu0 %v76_v6  ;;  %v122_v13 = vld [vmem:[#allocation5 + $0x1e0] sm:$0xff]  ;;  %v121_v17 = vld [vmem:[#allocation5 + $0x1d8] sm:$0xff]  ;;  %v88_v20 = vld [vmem:[#allocation5 + $0xd0] sm:$0xff]  ;;  %v971_v51 = vsub.s32 %v202_v41, %v204_v42 }
  0x2b   :  { %672 = vmatpush3.msra.mxu1 %v108_v7  ;;  %638 = vmatprep.subr.mxu0 %v91_v8  ;;  %v74_v14 = vld [vmem:[#allocation5 + $0x60] sm:$0xff]  ;;  %v73_v18 = vld [vmem:[#allocation5 + $0x58] sm:$0xff]  ;;  %v120_v21 = vld [vmem:[#allocation5 + $0x1d0] sm:$0xff] }
  0x2c   :  { %673 = vmatprep.subr.mxu1 %v123_v9  ;;  %v106_v15 = vld [vmem:[#allocation5 + $0x160] sm:$0xff]  ;;  %639 = vmatpush3.msra.mxu0 %v75_v10  ;;  %v105_v19 = vld [vmem:[#allocation5 + $0x158] sm:$0xff]  ;;  %v72_v22 = vld [vmem:[#allocation5 + $0x50] sm:$0xff] }
  0x2d   :  { %674 = vmatpush3.msra.mxu1 %v107_v11  ;;  %640 = vmatprep.subr.mxu0 %v90_v12  ;;  %v104_v23 = vld [vmem:[#allocation5 + $0x150] sm:$0xff]  ;;  %v87_v24 = vld [vmem:[#allocation5 + $0xc8] sm:$0xff]  ;;  %v86_v28 = vld [vmem:[#allocation5 + $0xc0] sm:$0xff] }
  0x2e   :  { %675 = vmatprep.subr.mxu1 %v122_v13  ;;  %641 = vmatpush3.msra.mxu0 %v74_v14  ;;  %v119_v25 = vld [vmem:[#allocation5 + $0x1c8] sm:$0xff]  ;;  %v118_v29 = vld [vmem:[#allocation5 + $0x1c0] sm:$0xff]  ;;  %v85_v35 = vld [vmem:[#allocation5 + $0xb8] sm:$0xff] }
  0x2f   :  { %676 = vmatpush3.msra.mxu1 %v106_v15  ;;  %642 = vmatprep.subr.mxu0 %v89_v16  ;;  %v71_v26 = vld [vmem:[#allocation5 + $0x48] sm:$0xff]  ;;  %v70_v33 = vld [vmem:[#allocation5 + $0x40] sm:$0xff]  ;;  %v117_v36 = vld [vmem:[#allocation5 + $0x1b8] sm:$0xff] }
  0x30   :  { %677 = vmatprep.subr.mxu1 %v121_v17  ;;  %643 = vmatpush3.msra.mxu0 %v73_v18  ;;  %v103_v27 = vld [vmem:[#allocation5 + $0x148] sm:$0xff]  ;;  %v102_v34 = vld [vmem:[#allocation5 + $0x140] sm:$0xff]  ;;  %v69_v37 = vld [vmem:[#allocation5 + $0x38] sm:$0xff] }
  0x31   :  { %678 = vmatpush3.msra.mxu1 %v105_v19  ;;  %644 = vmatprep.subr.mxu0 %v88_v20  ;;  %v101_v38 = vld [vmem:[#allocation5 + $0x138] sm:$0xff]  ;;  %v84_v39 = vld [vmem:[#allocation5 + $0xb0] sm:$0xff]  ;;  %v83_v45 = vld [vmem:[#allocation5 + $0xa8] sm:$0xff] }
  0x32   :  { %679 = vmatprep.subr.mxu1 %v120_v21  ;;  %645 = vmatpush3.msra.mxu0 %v72_v22  ;;  %v116_v40 = vld [vmem:[#allocation5 + $0x1b0] sm:$0xff]  ;;  %v115_v46 = vld [vmem:[#allocation5 + $0x1a8] sm:$0xff]  ;;  %v82_v49 = vld [vmem:[#allocation5 + $0xa0] sm:$0xff] }
  0x33   :  { %680 = vmatpush3.msra.mxu1 %v104_v23  ;;  %646 = vmatprep.subr.mxu0 %v87_v24  ;;  %v68_v43 = vld [vmem:[#allocation5 + $0x30] sm:$0xff]  ;;  %v67_v47 = vld [vmem:[#allocation5 + $0x28] sm:$0xff]  ;;  %v114_v50 = vld [vmem:[#allocation5 + $0x1a0] sm:$0xff] }
  0x34   :  { %681 = vmatprep.subr.mxu1 %v119_v25  ;;  %647 = vmatpush3.msra.mxu0 %v71_v26  ;;  %v100_v44 = vld [vmem:[#allocation5 + $0x130] sm:$0xff]  ;;  %v99_v48 = vld [vmem:[#allocation5 + $0x128] sm:$0xff]  ;;  %v66_v52 = vld [vmem:[#allocation5 + $0x20] sm:$0xff] }
  0x35   :  { %682 = vmatpush3.msra.mxu1 %v103_v27  ;;  %648 = vmatprep.subr.mxu0 %v86_v28  ;;  %v98_v53 = vld [vmem:[#allocation5 + $0x120] sm:$0xff]  ;;  %v60_v54 = vld [vmem:[#allocation2] sm:$0xff]  ;;  %v81_v55 = vld [vmem:[#allocation5 + $0x98] sm:$0xff] }
  0x36   :  { %683 = vmatprep.subr.mxu1 %v118_v29  ;;  %649 = vmatpush3.msra.mxu0 %v70_v33  ;;  %v113_v56 = vld [vmem:[#allocation5 + $0x198] sm:$0xff]  ;;  %v199_v57 = vcombine.high %v60_v54, %v60_v54  ;;  %v80_v60 = vld [vmem:[#allocation5 + $0x90] sm:$0xff]  ;;  %v206_v62 = vrot.slane %v60_v54, %v971_v51  ;;  %v79_v1 = vld [vmem:[#allocation5 + $0x88] sm:$0xff] }
  0x37   :  { %684 = vmatpush3.msra.mxu1 %v102_v34  ;;  %650 = vmatprep.subr.mxu0 %v85_v35  ;;  %v65_v58 = vld [vmem:[#allocation5 + $0x18] sm:$0xff]  ;;  %v112_v61 = vld [vmem:[#allocation5 + $0x190] sm:$0xff]  ;;  %v111_v2 = vld [vmem:[#allocation5 + $0x188] sm:$0xff] }
  0x38   :  { %685 = vmatprep.subr.mxu1 %v117_v36  ;;  %651 = vmatpush3.msra.mxu0 %v69_v37  ;;  %v97_v59 = vld [vmem:[#allocation5 + $0x118] sm:$0xff]  ;;  %v64_v63 = vld [vmem:[#allocation5 + $0x10] sm:$0xff]  ;;  %v213_v3 = vrot.slane %v199_v57, %v971_v51  ;;  %v63_v4 = vld [vmem:[#allocation5 + $0x8] sm:$0xff]  ;;  %v214_v8 = vcombine.high %v206_v62, %v206_v62 }
  0x39   :  { %686 = vmatpush3.msra.mxu1 %v101_v38  ;;  %652 = vmatprep.subr.mxu0 %v84_v39  ;;  %v96_v0 = vld [vmem:[#allocation5 + $0x110] sm:$0xff]  ;;  %v95_v5 = vld [vmem:[#allocation5 + $0x108] sm:$0xff]  ;;  %v78_v6 = vld [vmem:[#allocation5 + $0x80] sm:$0xff] }
  0x3a   :  { %687 = vmatprep.subr.mxu1 %v116_v40  ;;  %653 = vmatpush3.msra.mxu0 %v68_v43  ;;  %v110_v7 = vld [vmem:[#allocation5 + $0x180] sm:$0xff]  ;;  %v215_v11 = vcombine.high %v213_v3, %v213_v3  ;;  %v157_v12 = vld [vmem:[#allocation5 + $0x2f8] sm:$0xff]  ;;  %v156_v16 = vld [vmem:[#allocation5 + $0x2f0] sm:$0xff] }
  0x3b   :  { %688 = vmatpush3.msra.mxu1 %v100_v44  ;;  %654 = vmatprep.subr.mxu0 %v83_v45  ;;  %v62_v9 = vld [vmem:[#allocation5] sm:$0xff]  ;;  %v189_v13 = vld [vmem:[#allocation5 + $0x3f8] sm:$0xff]  ;;  %v188_v17 = vld [vmem:[#allocation5 + $0x3f0] sm:$0xff] }
  0x3c   :  { %689 = vmatprep.subr.mxu1 %v115_v46  ;;  %655 = vmatpush3.msra.mxu0 %v67_v47  ;;  %v94_v10 = vld [vmem:[#allocation5 + $0x100] sm:$0xff]  ;;  %v141_v14 = vld [vmem:[#allocation5 + $0x278] sm:$0xff]  ;;  %v140_v18 = vld [vmem:[#allocation5 + $0x270] sm:$0xff] }
  0x3d   :  { %690 = vmatpush3.msra.mxu1 %v99_v48  ;;  %656 = vmatprep.subr.mxu0 %v82_v49  ;;  %v173_v15 = vld [vmem:[#allocation5 + $0x378] sm:$0xff]  ;;  %v172_v19 = vld [vmem:[#allocation5 + $0x370] sm:$0xff]  ;;  %v155_v20 = vld [vmem:[#allocation5 + $0x2e8] sm:$0xff] }
  0x3e   :  { %691 = vmatprep.subr.mxu1 %v114_v50  ;;  %657 = vmatpush3.msra.mxu0 %v66_v52  ;;  %v187_v21 = vld [vmem:[#allocation5 + $0x3e8] sm:$0xff]  ;;  %v154_v24 = vld [vmem:[#allocation5 + $0x2e0] sm:$0xff]  ;;  %v153_v28 = vld [vmem:[#allocation5 + $0x2d8] sm:$0xff] }
  0x3f   :  { %692 = vmatpush3.msra.mxu1 %v98_v53  ;;  %658 = vmatprep.subr.mxu0 %v81_v55  ;;  %v139_v22 = vld [vmem:[#allocation5 + $0x268] sm:$0xff]  ;;  %v186_v25 = vld [vmem:[#allocation5 + $0x3e0] sm:$0xff]  ;;  %v185_v29 = vld [vmem:[#allocation5 + $0x3d8] sm:$0xff] }
  0x40   :  { %693 = vmatprep.subr.mxu1 %v113_v56  ;;  %659 = vmatpush3.msra.mxu0 %v65_v58  ;;  %v171_v23 = vld [vmem:[#allocation5 + $0x368] sm:$0xff]  ;;  %v138_v26 = vld [vmem:[#allocation5 + $0x260] sm:$0xff]  ;;  %v137_v30 = vld [vmem:[#allocation5 + $0x258] sm:$0xff] }
  0x41   :  { %694 = vmatpush3.msra.mxu1 %v97_v59  ;;  %660 = vmatprep.subr.mxu0 %v80_v60  ;;  %v170_v27 = vld [vmem:[#allocation5 + $0x360] sm:$0xff]  ;;  %v169_v31 = vld [vmem:[#allocation5 + $0x358] sm:$0xff]  ;;  %v152_v32 = vld [vmem:[#allocation5 + $0x2d0] sm:$0xff] }
  0x42   :  { %695 = vmatprep.subr.mxu1 %v112_v61  ;;  %661 = vmatpush3.msra.mxu0 %v64_v63  ;;  %v184_v33 = vld [vmem:[#allocation5 + $0x3d0] sm:$0xff]  ;;  %v151_v36 = vld [vmem:[#allocation5 + $0x2c8] sm:$0xff]  ;;  %v150_v40 = vld [vmem:[#allocation5 + $0x2c0] sm:$0xff] }
  0x43   :  { %696 = vmatpush3.msra.mxu1 %v96_v0  ;;  %662 = vmatprep.subr.mxu0 %v79_v1  ;;  %v136_v34 = vld [vmem:[#allocation5 + $0x250] sm:$0xff]  ;;  %v183_v37 = vld [vmem:[#allocation5 + $0x3c8] sm:$0xff]  ;;  %v182_v41 = vld [vmem:[#allocation5 + $0x3c0] sm:$0xff] }
  0x44   :  { %697 = vmatprep.subr.mxu1 %v111_v2  ;;  %663 = vmatpush3.msra.mxu0 %v63_v4  ;;  %v168_v35 = vld [vmem:[#allocation5 + $0x350] sm:$0xff]  ;;  %v135_v38 = vld [vmem:[#allocation5 + $0x248] sm:$0xff]  ;;  %v134_v42 = vld [vmem:[#allocation5 + $0x240] sm:$0xff] }
  0x45   :  { %698 = vmatpush3.msra.mxu1 %v95_v5  ;;  %664 = vmatprep.subr.mxu0 %v78_v6  ;;  %v167_v39 = vld [vmem:[#allocation5 + $0x348] sm:$0xff]  ;;  %v166_v43 = vld [vmem:[#allocation5 + $0x340] sm:$0xff]  ;;  %v149_v44 = vld [vmem:[#allocation5 + $0x2b8] sm:$0xff] }
  0x46   :  { %699 = vmatprep.subr.mxu1 %v110_v7  ;;  %665 = vmatpush3.msra.mxu0 %v62_v9  ;;  %v181_v45 = vld [vmem:[#allocation5 + $0x3b8] sm:$0xff]  ;;  %v148_v48 = vld [vmem:[#allocation5 + $0x2b0] sm:$0xff]  ;;  %v147_v53 = vld [vmem:[#allocation5 + $0x2a8] sm:$0xff] }
  0x47   :  { %305 = vmatprep.mubr.f32.mxu0 %v214_v8  ;;  %700 = vmatpush3.msra.mxu1 %v94_v10  ;;  %v133_v46 = vld [vmem:[#allocation5 + $0x238] sm:$0xff]  ;;  %v180_v49 = vld [vmem:[#allocation5 + $0x3b0] sm:$0xff]  ;;  %v179_v54 = vld [vmem:[#allocation5 + $0x3a8] sm:$0xff] }
  0x48   :  { %306 = vmatmul.mubr.f32.vlgmr.msra.gmra.mxu0 %v206_v62  ;;  %375 = vmatprep.mubr.f32.mxu1 %v215_v11  ;;  %v165_v47 = vld [vmem:[#allocation5 + $0x338] sm:$0xff]  ;;  %v132_v50 = vld [vmem:[#allocation5 + $0x230] sm:$0xff]  ;;  %v131_v56 = vld [vmem:[#allocation5 + $0x228] sm:$0xff] }
  0x49   :  { %704 = vmatprep.subr.mxu0 %v157_v12  ;;  %739 = vmatprep.subr.mxu1 %v189_v13  ;;  %v164_v52 = vld [vmem:[#allocation5 + $0x330] sm:$0xff]  ;;  %v61_v55 = vld [vmem:[#allocation2 + $0x8] sm:$0xff]  ;;  %v163_v57 = vld [vmem:[#allocation5 + $0x328] sm:$0xff] }
  0x4a   :  { %376 = vmatmul.mubr.f32.vlgmr.msra.gmra.mxu1 %v213_v3  ;;  %705 = vmatpush3.msra.mxu0 %v141_v14  ;;  %v146_v58 = vld [vmem:[#allocation5 + $0x2a0] sm:$0xff]  ;;  %v216_v62 = vcombine.high %v61_v55, %v61_v55  ;;  %v145_v63 = vld [vmem:[#allocation5 + $0x298] sm:$0xff]  ;;  %v144_v3 = vld [vmem:[#allocation5 + $0x290] sm:$0xff]  ;;  %v223_v5 = vrot.slane %v61_v55, %v971_v51 }
  0x4b   :  { %740 = vmatpush3.msra.mxu1 %v173_v15  ;;  %706 = vmatprep.subr.mxu0 %v156_v16  ;;  %v178_v59 = vld [vmem:[#allocation5 + $0x3a0] sm:$0xff]  ;;  %v177_v0 = vld [vmem:[#allocation5 + $0x398] sm:$0xff]  ;;  %v176_v4 = vld [vmem:[#allocation5 + $0x390] sm:$0xff] }
  0x4c   :  { %741 = vmatprep.subr.mxu1 %v188_v17  ;;  %707 = vmatpush3.msra.mxu0 %v140_v18  ;;  %v130_v60 = vld [vmem:[#allocation5 + $0x220] sm:$0xff]  ;;  %v129_v1 = vld [vmem:[#allocation5 + $0x218] sm:$0xff]  ;;  %v128_v6 = vld [vmem:[#allocation5 + $0x210] sm:$0xff]  ;;  %v230_v8 = vrot.slane %v216_v62, %v971_v51  ;;  %v231_v15 = vcombine.high %v223_v5, %v223_v5 }
  0x4d   :  { %742 = vmatpush3.msra.mxu1 %v172_v19  ;;  %708 = vmatprep.subr.mxu0 %v155_v20  ;;  %v162_v61 = vld [vmem:[#allocation5 + $0x320] sm:$0xff]  ;;  %v161_v2 = vld [vmem:[#allocation5 + $0x318] sm:$0xff]  ;;  %v160_v7 = vld [vmem:[#allocation5 + $0x310] sm:$0xff]  ;;  %v929_v19 = vmov 0.0  }
  0x4e   :  { %743 = vmatprep.subr.mxu1 %v187_v21  ;;  %709 = vmatpush3.msra.mxu0 %v139_v22  ;;  %v143_v9 = vld [vmem:[#allocation5 + $0x288] sm:$0xff]  ;;  %v142_v13 = vld [vmem:[#allocation5 + $0x280] sm:$0xff]  ;;  %v232_v17 = vcombine.high %v230_v8, %v230_v8  ;;  %v537_v18 = vld [vmem:[#allocation7 + $0x78] sm:$0xff] }
  0x4f   :  { %744 = vmatpush3.msra.mxu1 %v171_v23  ;;  %710 = vmatprep.subr.mxu0 %v154_v24  ;;  %v175_v10 = vld [vmem:[#allocation5 + $0x388] sm:$0xff]  ;;  %v174_v14 = vld [vmem:[#allocation5 + $0x380] sm:$0xff]  ;;  %v536_v20 = vld [vmem:[#allocation7 + $0x70] sm:$0xff] }
  0x50   :  { %745 = vmatprep.subr.mxu1 %v186_v25  ;;  %711 = vmatpush3.msra.mxu0 %v138_v26  ;;  %v127_v11 = vld [vmem:[#allocation5 + $0x208] sm:$0xff]  ;;  %v126_v16 = vld [vmem:[#allocation5 + $0x200] sm:$0xff]  ;;  %v533_v23 = vld [vmem:[#allocation7 + $0x58] sm:$0xff] }
  0x51   :  { %746 = vmatpush3.msra.mxu1 %v170_v27  ;;  %712 = vmatprep.subr.mxu0 %v153_v28  ;;  %v159_v12 = vld [vmem:[#allocation5 + $0x308] sm:$0xff]  ;;  %v158_v51 = vld [vmem:[#allocation5 + $0x300] sm:$0xff]  ;;  %v532_v24 = vld [vmem:[#allocation7 + $0x50] sm:$0xff] }
  0x52   :  { %747 = vmatprep.subr.mxu1 %v185_v29  ;;  %713 = vmatpush3.msra.mxu0 %v137_v30  ;;  %v535_v21 = vld [vmem:[#allocation7 + $0x68] sm:$0xff]  ;;  %v534_v22 = vld [vmem:[#allocation7 + $0x60] sm:$0xff]  ;;  %v529_v27 = vld [vmem:[#allocation7 + $0x38] sm:$0xff] }
  0x53   :  { %748 = vmatpush3.msra.mxu1 %v169_v31  ;;  %714 = vmatprep.subr.mxu0 %v152_v32  ;;  %v531_v25 = vld [vmem:[#allocation7 + $0x48] sm:$0xff]  ;;  %v530_v26 = vld [vmem:[#allocation7 + $0x40] sm:$0xff]  ;;  %v528_v28 = vld [vmem:[#allocation7 + $0x30] sm:$0xff] }
  0x54   :  { %749 = vmatprep.subr.mxu1 %v184_v33  ;;  %715 = vmatpush3.msra.mxu0 %v136_v34  ;;  %v527_v29 = vld [vmem:[#allocation7 + $0x28] sm:$0xff]  ;;  %v526_v30 = vld [vmem:[#allocation7 + $0x20] sm:$0xff]  ;;  %v525_v31 = vld [vmem:[#allocation7 + $0x18] sm:$0xff] }
  0x55   :  { %750 = vmatpush3.msra.mxu1 %v168_v35  ;;  %716 = vmatprep.subr.mxu0 %v151_v36  ;;  %v524_v32 = vld [vmem:[#allocation7 + $0x10] sm:$0xff]  ;;  %v523_v33 = vld [vmem:[#allocation7 + $0x8] sm:$0xff]  ;;  %v522_v34 = vld [vmem:[#allocation7] sm:$0xff] }
  0x56   :  { %751 = vmatprep.subr.mxu1 %v183_v37  ;;  %717 = vmatpush3.msra.mxu0 %v135_v38 }
  0x57   :  { %752 = vmatpush3.msra.mxu1 %v167_v39  ;;  %718 = vmatprep.subr.mxu0 %v150_v40  ;;  %v632_v39 = vld [vmem:[%s988_s2] ss:$0 sm:$0xff]  ;;  %s622_s2 = sshll.u32 %s931_s11, 4  ;;  %s623_s2 = int_to_ptr.vmem [resolvable:$true] %s622_s2 }
  0x58   :  { %753 = vmatprep.subr.mxu1 %v182_v41  ;;  %719 = vmatpush3.msra.mxu0 %v134_v42  ;;  %s897_s12 = scalar_lea.vmem %s623_s2, 32  ;;  %p902_p2 = scmp.lt.s32.totalorder %s623_s2, %s623_s2 }
  0x59   :  { %754 = vmatpush3.msra.mxu1 %v166_v43  ;;  %720 = vmatprep.subr.mxu0 %v149_v44  ;;  %p898_p1 = scmp.ne.s32.totalorder %s623_s2, %s897_s12  ;;  %p903_p3 = scmp.lt.s32.totalorder %s897_s12, %s897_s12 }
  0x5a   :  { %755 = vmatprep.subr.mxu1 %v181_v45  ;;  %721 = vmatpush3.msra.mxu0 %v133_v46 }
  0x5b   :  { %756 = vmatpush3.msra.mxu1 %v165_v47  ;;  %722 = vmatprep.subr.mxu0 %v148_v48  ;;  %p904_p4 = por %p903_p3, %p902_p2 }
  0x5c   :  { %757 = vmatprep.subr.mxu1 %v180_v49  ;;  %723 = vmatpush3.msra.mxu0 %v132_v50 }
  0x5d   :  { %758 = vmatpush3.msra.mxu1 %v164_v52  ;;  %724 = vmatprep.subr.mxu0 %v147_v53  ;;  %p905_p5 = pnand %p904_p4, %p898_p1 }
  0x5e   :  { %759 = vmatprep.subr.mxu1 %v179_v54  ;;  %725 = vmatpush3.msra.mxu0 %v131_v56  ;;  %v633_v54 = vld [vmem:[%s990_s4] ss:$0 sm:$0xff] }
  0x5f   :  { %760 = vmatpush3.msra.mxu1 %v163_v57  ;;  %726 = vmatprep.subr.mxu0 %v146_v58 }
  0x60   :  { %761 = vmatprep.subr.mxu1 %v178_v59  ;;  %727 = vmatpush3.msra.mxu0 %v130_v60 }
  0x61   :  { %762 = vmatpush3.msra.mxu1 %v162_v61  ;;  %728 = vmatprep.subr.mxu0 %v145_v63 }
  0x62   :  { %763 = vmatprep.subr.mxu1 %v177_v0  ;;  %729 = vmatpush3.msra.mxu0 %v129_v1 }
  0x63   :  { %764 = vmatpush3.msra.mxu1 %v161_v2  ;;  %730 = vmatprep.subr.mxu0 %v144_v3 }
  0x64   :  { %765 = vmatprep.subr.mxu1 %v176_v4  ;;  %731 = vmatpush3.msra.mxu0 %v128_v6 }
  0x65   :  { %766 = vmatpush3.msra.mxu1 %v160_v7  ;;  %732 = vmatprep.subr.mxu0 %v143_v9 }
  0x66   :  { %767 = vmatprep.subr.mxu1 %v175_v10  ;;  %733 = vmatpush3.msra.mxu0 %v127_v11 }
  0x67   :  { %768 = vmatpush3.msra.mxu1 %v159_v12  ;;  %734 = vmatprep.subr.mxu0 %v142_v13 }
  0x68   :  { %769 = vmatprep.subr.mxu1 %v174_v14  ;;  %735 = vmatpush3.msra.mxu0 %v126_v16 }
  0x69   :  { %445 = vmatprep.mubr.f32.mxu0 %v231_v15  ;;  %770 = vmatpush3.msra.mxu1 %v158_v51 }
  0x6a   :  { %515 = vmatprep.mubr.f32.mxu1 %v232_v17  ;;  %446 = vmatmul.mubr.f32.vlgmr.msra.gmra.mxu0 %v223_v5 }
  0x6b   :  { %516 = vmatmul.mubr.f32.vlgmr.msra.gmra.mxu1 %v230_v8  ;;  %791 = vmatprep.subr.mxu0 %v929_v19 }
  0x6c   :  { %792 = vmatpush3.msra.mxu0 %v537_v18  ;;  %823 = vmatprep.mubr.msk.f32.mxu0 %vm930_vm0, %v929_v19 }
  0x6d   :  { %793 = vmatprep.subr.mxu0 %v929_v19 }
  0x6e   :  { %794 = vmatpush3.msra.mxu0 %v536_v20 }
  0x6f   :  { %795 = vmatprep.subr.mxu0 %v929_v19 }
  0x70   :  { %796 = vmatpush3.msra.mxu0 %v535_v21 }
  0x71   :  { %797 = vmatprep.subr.mxu0 %v929_v19 }
  0x72   :  { %798 = vmatpush3.msra.mxu0 %v534_v22 }
  0x73   :  { %799 = vmatprep.subr.mxu0 %v929_v19 }
  0x74   :  { %800 = vmatpush3.msra.mxu0 %v533_v23 }
  0x75   :  { %801 = vmatprep.subr.mxu0 %v929_v19 }
  0x76   :  { %802 = vmatpush3.msra.mxu0 %v532_v24 }
  0x77   :  { %803 = vmatprep.subr.mxu0 %v929_v19 }
  0x78   :  { %804 = vmatpush3.msra.mxu0 %v531_v25 }
  0x79   :  { %805 = vmatprep.subr.mxu0 %v929_v19 }
  0x7a   :  { %806 = vmatpush3.msra.mxu0 %v530_v26 }
  0x7b   :  { %807 = vmatprep.subr.mxu0 %v929_v19 }
  0x7c   :  { %808 = vmatpush3.msra.mxu0 %v529_v27 }
  0x7d   :  { %809 = vmatprep.subr.mxu0 %v929_v19 }
  0x7e   :  { %810 = vmatpush3.msra.mxu0 %v528_v28 }
  0x7f   :  { %811 = vmatprep.subr.mxu0 %v929_v19 }
  0x80   :  { %812 = vmatpush3.msra.mxu0 %v527_v29 }
  0x81   :  { %813 = vmatprep.subr.mxu0 %v929_v19 }
  0x82   :  { %814 = vmatpush3.msra.mxu0 %v526_v30 }
  0x83   :  { %815 = vmatprep.subr.mxu0 %v929_v19 }
  0x84   :  { %816 = vmatpush3.msra.mxu0 %v525_v31 }
  0x85   :  { %817 = vmatprep.subr.mxu0 %v929_v19 }
  0x86   :  { %818 = vmatpush3.msra.mxu0 %v524_v32 }
  0x87   :  { %819 = vmatprep.subr.mxu0 %v929_v19 }
  0x88   :  { %820 = vmatpush3.msra.mxu0 %v523_v33 }
  0x89   :  { %821 = vmatprep.subr.mxu0 %v929_v19 }
  0x8a   :  { %822 = vmatpush3.msra.mxu0 %v522_v34 }
 0x108   :  { %v666_v35 = vpop.f32.mrf.mxu0 }
 0x10a   :  { %v701_v36 = vpop.f32.mrf.mxu1  ;;  %v667_v37 = vpop.f32.mrf.mxu0 }
 0x10b   :  { %v668_v38 = vadd.f32 %v667_v37, %v666_v35 }
 0x10c   :  { %v702_v40 = vpop.f32.mrf.mxu1 }
 0x10d   :  { %v308_v41 = vadd.f32 %v668_v38, %v632_v39  ;;  %v703_v42 = vadd.f32 %v702_v40, %v701_v36 }
 0x10f   :  { %v378_v47 = vadd.f32 %v703_v42, %v308_v41 }
 0x12a   :  { %v736_v43 = vpop.f32.mrf.mxu0 }
 0x12b   :  { %v771_v44 = vpop.f32.mrf.mxu1 }
 0x12c   :  { %v737_v45 = vpop.f32.mrf.mxu0 }
 0x12d   :  { %v772_v46 = vpop.f32.mrf.mxu1  ;;  %v738_v48 = vadd.f32 %v737_v45, %v736_v43 }
 0x12e   :  { %v773_v50 = vadd.f32 %v772_v46, %v771_v44 }
 0x12f   :  { %v448_v49 = vadd.f32 %v738_v48, %v378_v47 }
 0x131   :  { %v518_v52 = vadd.f32 %v773_v50, %v448_v49 }
 0x133   :  { %v521_v53 = vmax.f32 %v518_v52, 0.0 }
 0x135   :  { %824 = vmatmul.mubr.f32.vlgmr.msra.gmra.mxu0 %v521_v53 }
 0x1f5   :  { %v611_v55 = vpop.f32.mrf.mxu0 }
 0x1f6   :  { %v612_v56 = vadd.f32 %v633_v54, %v611_v55 }
 0x1f7   :  { %v825_v57 = vpop.f32.mrf.mxu0 }
 0x1f8   :  { %615 = vst [vmem:[#allocation8] sm:$0x3] %v612_v56 }
 0x1f9   :  { %908 = shalt.err (!%p905_p5)
}
 0x1fa   :  { %625 = dma.vmem_to_hbm [thread:$0]  %s623_s2, 32, %s991_s5, [#allocation4]  }
 0x1fb   :  { %921 = dma.done.wait [#allocation4], 32  }
 0x1fc   :  { %922 = vsyncadd [#allocation4], 4294967264 }
 0x1fd   :  { %629 = vsyncpa [#allocation3], 1 }
 0x1fe   :  { %630 = vsyncpa [#allocation6], 1 }
 0x1ff   :  { %631 = vsyncpa [#allocation4], 1 }

</bundles_post_ra>
